<compile_context>
chip_gen: v7x
topology: tpu7x:2x2x1
jax: 0.10.0
libtpu: 0.0.40
codegen_flags: <defaults>
</compile_context>

<pallas_src>
import jax
import jax.numpy as jnp
from jax.experimental import pallas as pl
from jax.experimental.pallas import tpu as pltpu

INPUT_SIZE = 100
KERNEL_SIZE = 3
NUM_CHANNELS = 3
POOL_SIZE = 3
NUM_CLASSES = 2
CONV_LEN = INPUT_SIZE - KERNEL_SIZE + 1                        # 98
OUT_LEN = (INPUT_SIZE - (KERNEL_SIZE // 2) * 2) // POOL_SIZE   # 32 (matches module)
FEAT = NUM_CHANNELS * OUT_LEN                                  # 96
FEAT_PAD = 128                                                 # lane-aligned feature block
TOEP_COLS = POOL_SIZE * FEAT_PAD                               # 384 = 3 pooling phases x 128


def cnn_kernel(x_ref, wtoe_ref, bconv_ref, wlin_ref, blin_ref, out_ref):
    """x_ref:    (TILE_B, 100) f32  one batch tile, natural (batch, time) layout
       wtoe_ref: (100, 384)   f32  Toeplitz conv weights (3 phase blocks of 128 cols)
       bconv_ref:(1, 128)     f32  conv bias per pooled feature (cols 96..127 = 0)
       wlin_ref: (128, 2)     f32  linear weight^T (rows 96..127 = 0)
       blin_ref: (1, 2)       f32  linear bias
       out_ref:  (TILE_B, 2)  f32  log-softmax output
    """
    # All 3 channels x 32 pool positions x 3 pooling phases in ONE MXU pass
    # (MXU was idle before; VALU was the binding slot).
    y = jnp.dot(x_ref[...], wtoe_ref[...],
                preferred_element_type=jnp.float32,
                precision=jax.lax.Precision.HIGHEST)                     # (TILE_B, 384)

    # Max over the 3 pooling phases: 128-lane-aligned vreg views, pure VPU.
    cand = jnp.maximum(jnp.maximum(y[:, 0:FEAT_PAD], y[:, FEAT_PAD:2 * FEAT_PAD]),
                       y[:, 2 * FEAT_PAD:3 * FEAT_PAD])                  # (TILE_B, 128)

    # Bias added once after the max; ReLU after (relu∘max == max∘relu, monotone).
    # Padded cols 96..127 stay exactly 0 (zero Toeplitz cols, zero bias).
    pooled = jnp.maximum(cand + bconv_ref[...], 0.0)                     # (TILE_B, 128)

    # Linear(96 -> 2); padded rows of wlin are zero so they contribute nothing.
    logits = jnp.dot(pooled, wlin_ref[...],
                     preferred_element_type=jnp.float32,
                     precision=jax.lax.Precision.HIGHEST) + blin_ref[...]  # (TILE_B, 2)

    # Closed-form 2-class log-softmax — strictly row-local (no cross-batch ops),
    # which is what makes the partial edge tile safe.
    l0 = logits[:, 0:1]
    l1 = logits[:, 1:2]
    m = jnp.maximum(l0, l1)
    lse = m + jnp.log(1.0 + jnp.exp(-jnp.abs(l0 - l1)))                  # (TILE_B, 1)
    out_ref[...] = logits - lse


def _round_up(n, m):
    return ((n + m - 1) // m) * m


def _choose_tile_b(batch):
    """Adaptive tile: clamp(round_up(B,128), 128, 2048); prefer >=2 grid steps
    for moderate/large B so both v7x TensorCores get work."""
    target = pl.cdiv(batch, 2) if batch > 128 else batch
    return int(min(2048, max(128, _round_up(target, 128))))


def _build_toeplitz(wconv):
    """(3,3) conv weights -> (100, 384) Toeplitz matrix.

    Column layout: col = phase*128 + c*32 + t holds the taps producing the
    (pre-bias) conv output of channel c at sequence position 3*t + phase.
    Columns 96..127 of each 128-wide phase block are zero padding.
    """
    p, c, t, j = jnp.meshgrid(jnp.arange(POOL_SIZE), jnp.arange(NUM_CHANNELS),
                              jnp.arange(OUT_LEN), jnp.arange(KERNEL_SIZE),
                              indexing="ij")
    rows = POOL_SIZE * t + p + j                       # sequence index, max 97 < 100
    cols = p * FEAT_PAD + c * OUT_LEN + t              # unique (row, col) pairs
    vals = wconv.astype(jnp.float32)[c, j]
    return jnp.zeros((INPUT_SIZE, TOEP_COLS), jnp.float32).at[
        rows.ravel(), cols.ravel()].set(vals.ravel())


def cnn_forward(x, wconv, bconv, wlin, blin, *, tile_b=None):
    """x: (B, 1, INPUT_SIZE) float32 (NCL, like the PyTorch module). Returns (B, 2)."""
    B = x.shape[0]
    # Free layout-preserving reshape — no transpose, no pad, no extra HBM pass.
    x2 = x.reshape(B, INPUT_SIZE).astype(jnp.float32)

    if tile_b is None:
        tile_b = _choose_tile_b(B)
    num_tiles = pl.cdiv(B, tile_b)

    wtoe = _build_toeplitz(wconv)                                         # (100, 384)
    bias_row = jnp.zeros((1, FEAT_PAD), jnp.float32).at[0, :FEAT].set(
        jnp.repeat(bconv.astype(jnp.float32), OUT_LEN))                   # (1, 128)
    wlin_pad = jnp.zeros((FEAT_PAD, NUM_CLASSES), jnp.float32).at[:FEAT, :].set(
        wlin.astype(jnp.float32).T)                                       # (128, 2)
    blin_row = blin.astype(jnp.float32).reshape(1, NUM_CLASSES)           # (1, 2)

    out = pl.pallas_call(
        cnn_kernel,
        out_shape=jax.ShapeDtypeStruct((B, NUM_CLASSES), jnp.float32),
        grid_spec=pltpu.PrefetchScalarGridSpec(
            num_scalar_prefetch=0,
            grid=(num_tiles,),
            in_specs=[
                pl.BlockSpec((tile_b, INPUT_SIZE), lambda i: (i, 0)),      # batch tile
                pl.BlockSpec(memory_space=pltpu.MemorySpace.VMEM),         # Toeplitz (100,384)
                pl.BlockSpec(memory_space=pltpu.MemorySpace.VMEM),         # conv bias row (1,128)
                pl.BlockSpec(memory_space=pltpu.MemorySpace.VMEM),         # linear weight^T (128,2)
                pl.BlockSpec(memory_space=pltpu.MemorySpace.VMEM),         # linear bias (1,2)
            ],
            out_specs=pl.BlockSpec((tile_b, NUM_CLASSES), lambda i: (i, 0)),
        ),
        compiler_params=pltpu.CompilerParams(
            dimension_semantics=("parallel",),                             # v7x: 2 TCs
        ),
    )(x2, wtoe, bias_row, wlin_pad, blin_row)
    return out                                                             # (B, 2)


def ref_forward(x, wconv, bconv, wlin, blin):
    """Pure-JAX reference reproducing the PyTorch forward pass in f32."""
    xs = x[:, 0, :].astype(jnp.float32)
    conv = jnp.stack(
        [sum(wconv[c, j] * xs[:, j:j + CONV_LEN] for j in range(KERNEL_SIZE)) + bconv[c]
         for c in range(NUM_CHANNELS)], axis=1)                            # (B, 3, 98)
    y = jnp.maximum(conv, 0.0)
    pooled = y[:, :, :OUT_LEN * POOL_SIZE].reshape(
        x.shape[0], NUM_CHANNELS, OUT_LEN, POOL_SIZE).max(axis=-1)         # (B, 3, 32)
    feat = pooled.reshape(x.shape[0], FEAT)                                # (B, 96)
    logits = jnp.dot(feat, wlin.T, precision=jax.lax.Precision.HIGHEST) + blin
    return jax.nn.log_softmax(logits, axis=1)


if __name__ == "__main__":
    key = jax.random.PRNGKey(0)
    kx, kwc, kbc, kwl, kbl = jax.random.split(key, 5)

    # Conv1d(1, 3, 3): weight (3, 1, 3) stored squeezed as (3, 3); bias (3,)
    wconv = jax.random.normal(kwc, (NUM_CHANNELS, KERNEL_SIZE), dtype=jnp.float32) * 0.3
    bconv = jax.random.normal(kbc, (NUM_CHANNELS,), dtype=jnp.float32) * 0.1
    # Linear(96, 2): weight (2, 96), bias (2,)
    wlin = jax.random.normal(kwl, (NUM_CLASSES, FEAT), dtype=jnp.float32) * 0.1
    blin = jax.random.normal(kbl, (NUM_CLASSES,), dtype=jnp.float32) * 0.1

    # Small batch (single partial tile) — the module's expected usage.
    B = 4
    x = jax.random.normal(kx, (B, 1, INPUT_SIZE), dtype=jnp.float32)
    out = jax.block_until_ready(cnn_forward(x, wconv, bconv, wlin, blin))
    ref = ref_forward(x, wconv, bconv, wlin, blin)
    assert out.shape == (B, NUM_CLASSES)
    assert jnp.allclose(out, ref, atol=1e-4, rtol=1e-4), float(jnp.max(jnp.abs(out - ref)))

    # Adaptive tiling: B=300 -> tile_b=256, 2 tiles, partial edge tile of 44 rows.
    B2 = 300
    x2 = jax.random.normal(kx, (B2, 1, INPUT_SIZE), dtype=jnp.float32)
    out2 = jax.block_until_ready(cnn_forward(x2, wconv, bconv, wlin, blin))
    ref2 = ref_forward(x2, wconv, bconv, wlin, blin)
    assert out2.shape == (B2, NUM_CLASSES)
    assert jnp.allclose(out2, ref2, atol=1e-4, rtol=1e-4), float(jnp.max(jnp.abs(out2 - ref2)))

    # Explicit small-tile override: 3 grid steps including a remainder tile.
    out3 = jax.block_until_ready(cnn_forward(x2, wconv, bconv, wlin, blin, tile_b=128))
    assert jnp.allclose(out3, ref2, atol=1e-4, rtol=1e-4), float(jnp.max(jnp.abs(out3 - ref2)))

    print("KERNEL_OK")
</pallas_src>

<mosaic_0001>
module attributes {stable_mosaic.version = 11 : i64} {
  func.func @cnn_kernel(%arg0: i32, %arg1: memref<128x100xf32, #tpu.memory_space<vmem>>, %arg2: memref<100x384xf32, #tpu.memory_space<vmem>>, %arg3: memref<1x128xf32, #tpu.memory_space<vmem>>, %arg4: memref<128x2xf32, #tpu.memory_space<vmem>>, %arg5: memref<1x2xf32, #tpu.memory_space<vmem>>, %arg6: memref<128x2xf32, #tpu.memory_space<vmem>>) attributes {dimension_semantics = [#tpu.dimension_semantics<parallel>], iteration_bounds = array<i64: 1>, scalar_prefetch = 0 : i64, scratch_operands = 0 : i64, tpu.core_type = #tpu.core_type<tc>, window_params = [{transform_indices = @transform_0, window_bounds = array<i64: 128, 100>}, {pipeline_mode = #tpu.pipeline_mode<synchronous>, transform_indices = @transform_1, window_bounds = array<i64: 100, 384>}, {pipeline_mode = #tpu.pipeline_mode<synchronous>, transform_indices = @transform_2, window_bounds = array<i64: 1, 128>}, {pipeline_mode = #tpu.pipeline_mode<synchronous>, transform_indices = @transform_3, window_bounds = array<i64: 128, 2>}, {pipeline_mode = #tpu.pipeline_mode<synchronous>, transform_indices = @transform_4, window_bounds = array<i64: 1, 2>}, {transform_indices = @transform_5, window_bounds = array<i64: 128, 2>}]} {
    %c0 = arith.constant 0 : index
    %c0_0 = arith.constant 0 : index
    %0 = vector.load %arg1[%c0, %c0_0] : memref<128x100xf32, #tpu.memory_space<vmem>>, vector<128x100xf32>
    %c0_1 = arith.constant 0 : index
    %c0_2 = arith.constant 0 : index
    %1 = vector.load %arg2[%c0_1, %c0_2] : memref<100x384xf32, #tpu.memory_space<vmem>>, vector<100x384xf32>
    %cst = arith.constant dense<0.000000e+00> : vector<128x384xf32>
    %2 = tpu.matmul %0, %1, %cst {dimension_numbers = #tpu.dot_dimension_numbers<[1], [0], [0], [1], [0, 0, 1, 1], [], []>, precision = #tpu.contract_precision<fp32>} : vector<128x100xf32>, vector<100x384xf32>, vector<128x384xf32> -> vector<128x384xf32>
    %3 = vector.extract_strided_slice %2 {offsets = [0, 0], sizes = [128, 128], strides = [1, 1]} : vector<128x384xf32> to vector<128x128xf32>
    %4 = vector.extract_strided_slice %2 {offsets = [0, 128], sizes = [128, 128], strides = [1, 1]} : vector<128x384xf32> to vector<128x128xf32>
    %5 = arith.maximumf %3, %4 : vector<128x128xf32>
    %6 = vector.extract_strided_slice %2 {offsets = [0, 256], sizes = [128, 128], strides = [1, 1]} : vector<128x384xf32> to vector<128x128xf32>
    %7 = arith.maximumf %5, %6 : vector<128x128xf32>
    %c0_3 = arith.constant 0 : index
    %c0_4 = arith.constant 0 : index
    %8 = vector.load %arg3[%c0_3, %c0_4] : memref<1x128xf32, #tpu.memory_space<vmem>>, vector<1x128xf32>
    %9 = vector.broadcast %8 : vector<1x128xf32> to vector<128x128xf32>
    %10 = arith.addf %7, %9 : vector<128x128xf32>
    %cst_5 = arith.constant 0.000000e+00 : f32
    %11 = vector.broadcast %cst_5 : f32 to vector<128x128xf32>
    %12 = arith.maximumf %10, %11 : vector<128x128xf32>
    %c0_6 = arith.constant 0 : index
    %c0_7 = arith.constant 0 : index
    %13 = vector.load %arg4[%c0_6, %c0_7] : memref<128x2xf32, #tpu.memory_space<vmem>>, vector<128x2xf32>
    %cst_8 = arith.constant dense<0.000000e+00> : vector<128x2xf32>
    %14 = tpu.matmul %12, %13, %cst_8 {dimension_numbers = #tpu.dot_dimension_numbers<[1], [0], [0], [1], [0, 0, 1, 1], [], []>, precision = #tpu.contract_precision<fp32>} : vector<128x128xf32>, vector<128x2xf32>, vector<128x2xf32> -> vector<128x2xf32>
    %c0_9 = arith.constant 0 : index
    %c0_10 = arith.constant 0 : index
    %15 = vector.load %arg5[%c0_9, %c0_10] : memref<1x2xf32, #tpu.memory_space<vmem>>, vector<1x2xf32>
    %16 = vector.broadcast %15 : vector<1x2xf32> to vector<128x2xf32>
    %17 = arith.addf %14, %16 : vector<128x2xf32>
    %18 = vector.extract_strided_slice %17 {offsets = [0, 0], sizes = [128, 1], strides = [1, 1]} : vector<128x2xf32> to vector<128x1xf32>
    %19 = vector.extract_strided_slice %17 {offsets = [0, 1], sizes = [128, 1], strides = [1, 1]} : vector<128x2xf32> to vector<128x1xf32>
    %20 = arith.maximumf %18, %19 : vector<128x1xf32>
    %21 = arith.subf %18, %19 : vector<128x1xf32>
    %22 = math.absf %21 : vector<128x1xf32>
    %cst_11 = arith.constant 0.000000e+00 : f32
    %23 = vector.broadcast %cst_11 : f32 to vector<128x1xf32>
    %24 = arith.subf %23, %22 : vector<128x1xf32>
    %25 = math.exp %24 : vector<128x1xf32>
    %cst_12 = arith.constant 1.000000e+00 : f32
    %26 = vector.broadcast %cst_12 : f32 to vector<128x1xf32>
    %27 = arith.addf %26, %25 : vector<128x1xf32>
    %28 = math.log %27 : vector<128x1xf32>
    %29 = arith.addf %20, %28 : vector<128x1xf32>
    %30 = vector.broadcast %29 : vector<128x1xf32> to vector<128x2xf32>
    %31 = arith.subf %17, %30 : vector<128x2xf32>
    %c0_13 = arith.constant 0 : index
    %c0_14 = arith.constant 0 : index
    %32 = vector.load %arg6[%c0_13, %c0_14] : memref<128x2xf32, #tpu.memory_space<vmem>>, vector<128x2xf32>
    tpu.vector_store %arg6[%c0_13, %c0_14], %31 {strides = array<i32>} : memref<128x2xf32, #tpu.memory_space<vmem>>, vector<128x2xf32>,
    return
  }
  func.func @transform_0(%arg0: i32) -> (i32, i32) {
    %c0_i32 = arith.constant 0 : i32
    %c0_i32_0 = arith.constant 0 : i32
    return %arg0, %c0_i32 : i32, i32
  }
  func.func @transform_1(%arg0: i32) -> (i32, i32) {
    %c0_i32 = arith.constant 0 : i32
    %c0_i32_0 = arith.constant 0 : i32
    %c0_i32_1 = arith.constant 0 : i32
    return %c0_i32, %c0_i32_0 : i32, i32
  }
  func.func @transform_2(%arg0: i32) -> (i32, i32) {
    %c0_i32 = arith.constant 0 : i32
    %c0_i32_0 = arith.constant 0 : i32
    %c0_i32_1 = arith.constant 0 : i32
    return %c0_i32, %c0_i32_0 : i32, i32
  }
  func.func @transform_3(%arg0: i32) -> (i32, i32) {
    %c0_i32 = arith.constant 0 : i32
    %c0_i32_0 = arith.constant 0 : i32
    %c0_i32_1 = arith.constant 0 : i32
    return %c0_i32, %c0_i32_0 : i32, i32
  }
  func.func @transform_4(%arg0: i32) -> (i32, i32) {
    %c0_i32 = arith.constant 0 : i32
    %c0_i32_0 = arith.constant 0 : i32
    %c0_i32_1 = arith.constant 0 : i32
    return %c0_i32, %c0_i32_0 : i32, i32
  }
  func.func @transform_5(%arg0: i32) -> (i32, i32) {
    %c0_i32 = arith.constant 0 : i32
    %c0_i32_0 = arith.constant 0 : i32
    return %arg0, %c0_i32 : i32, i32
  }
}

</mosaic_0001>

<bundles_post_ra>
// kernel: tpu_custom_call.1
= control target key start
LH: loop header
LB: loop body
LE: loop exit
PB: predicated region body
PF: predicated region fallthrough
CT: control target
= control target key end

     0   :  { %10 = vsyncpa [#allocation3], 0  ;;  %s6580_s18 = smov [#allocation2]   ;;  %s8673_s0 = inlined_call_operand.vmem [shape: f32[4,100], index: 0, kind: input, shape index: {}]   ;;  %s8674_s1 = inlined_call_operand.hbm [shape: f32[100,384], index: 1, kind: input, shape index: {}]   ;;  %s8675_s2 = inlined_call_operand.vmem [shape: f32[1,128], index: 2, kind: input, shape index: {}]   ;;  %s8676_s3 = inlined_call_operand.vmem [shape: f32[128,2], index: 3, kind: input, shape index: {}]   ;;  %s8677_s4 = inlined_call_operand.vmem [shape: f32[1,2], index: 4, kind: input, shape index: {}]   ;;  %s8678_s5 = inlined_call_operand.vmem [shape: f32[4,2], index: 5, kind: output, shape index: {}]  }
   0x1   :  { %s18_s19 = sshll.u32 %s6580_s18, 4  ;;  %s6556_s22 = scalar_lea.hbm %s8674_s1, 4992  ;;  %s19_s19 = int_to_ptr.vmem [resolvable:$true] %s18_s19 }
   0x2   :  { %p6557_p0 = scmp.ne.s32.totalorder %s8674_s1, %s6556_s22  ;;  %p6560_p1 = scmp.lt.u32.totalorder %s6556_s22, %s8674_s1 }
   0x4   :  { %p6562_p2 = pnand %p6560_p1, %p6557_p0 }
   0x6   :  { %6565 = shalt.err (!%p6562_p2)
}
   0x7   :  { %s6566_s27 = scalar_lea.vmem %s19_s19, 4992  ;;  %p6571_p4 = scmp.lt.s32.totalorder %s19_s19, %s19_s19 }
   0x8   :  { %p6567_p3 = scmp.ne.s32.totalorder %s19_s19, %s6566_s27  ;;  %p6572_p5 = scmp.lt.s32.totalorder %s6566_s27, %s6566_s27 }
   0xa   :  { %p6573_p6 = por %p6572_p5, %p6571_p4 }
   0xc   :  { %p6574_p7 = pnand %p6573_p6, %p6567_p3 }
   0xe   :  { %6577 = shalt.err (!%p6574_p7)
}
   0xf   :  { %s6581_s28 = smov 384   ;;  %s6582_s29 = smov 24  }
  0x10   :  { %24 = dma.hbm_to_vmem [thread:$0]  %s8674_s1, 4992, %s19_s19, [#allocation3], %s6581_s28, %s6581_s28, %s6582_s29  }
  0x11   :  { %6578 = dma.done.wait [#allocation3], 4992  }
  0x12   :  { %6579 = vsyncadd [#allocation3], 4294962304  ;;  %v8683_v0 = vmov 0.0   ;;  %v51_v1 = vld [vmem:[#allocation2 + $0x8] sm:$0xff]  ;;  %v54_v2 = vld [vmem:[#allocation2 + $0x20] sm:$0xff]  ;;  %vm138_vm0 = vcmask 1043456  }
  0x13   :  { %238 = vmatprep.mubr.f32.mxu0 %v8683_v0  ;;  %v50_v3 = vld [vmem:[#allocation2] sm:$0xff]  ;;  %v148_v4 = vand.u32 4294901760, %v51_v1  ;;  %v152_v5 = vand.u32 4294901760, %v54_v2  ;;  %v53_v6 = vld [vmem:[#allocation2 + $0x18] sm:$0xff]  ;;  %v60_v9 = vld [vmem:[#allocation2 + $0x50] sm:$0xff]  ;;  %vm89_vm1 = vcmask 818176  }
  0x14   :  { %v150_v7 = vand.u32 4294901760, %v50_v3  ;;  %v57_v8 = vld [vmem:[#allocation2 + $0x38] sm:$0xff]  ;;  %v154_v10 = vand.u32 4294901760, %v53_v6  ;;  %v160_v12 = vand.u32 4294901760, %v60_v9  ;;  %v56_v13 = vld [vmem:[#allocation2 + $0x30] sm:$0xff]  ;;  %v59_v14 = vld [vmem:[#allocation2 + $0x48] sm:$0xff] }
  0x15   :  { %v156_v11 = vand.u32 4294901760, %v57_v8  ;;  %v63_v15 = vld [vmem:[#allocation2 + $0x68] sm:$0xff]  ;;  %v6629_v16 = vpack.c.bf16 %v152_v5, %v148_v4  ;;  %v6631_v17 = vsub.f32 %v51_v1, %v148_v4  ;;  %v6633_v18 = vsub.f32 %v54_v2, %v152_v5  ;;  %v66_v20 = vld [vmem:[#allocation2 + $0x80] sm:$0xff]  ;;  %v65_v22 = vld [vmem:[#allocation2 + $0x78] sm:$0xff]  ;;  %s6584_s18 = smov 127  }
  0x16   :  { %v6635_v19 = vsub.f32 %v50_v3, %v150_v7  ;;  %v62_v21 = vld [vmem:[#allocation2 + $0x60] sm:$0xff]  ;;  %v6637_v23 = vpack.c.bf16 %v154_v10, %v150_v7  ;;  %v6639_v24 = vsub.f32 %v53_v6, %v154_v10  ;;  %v69_v27 = vld [vmem:[#allocation2 + $0x98] sm:$0xff]  ;;  %v6646_v28 = vsub.f32 %v60_v9, %v160_v12  ;;  %v72_v32 = vld [vmem:[#allocation2 + $0xb0] sm:$0xff] }
  0x17   :  { %8893 = vst [vmem:[#allocation6_spill] sm:$0xff] %v6629_v16  ;;  %8894 = vst [vmem:[#allocation7_spill] sm:$0xff] %v6633_v18  ;;  %v6641_v25 = vpack.c.bf16 %v160_v12, %v156_v11  ;;  %v6643_v26 = vsub.f32 %v57_v8, %v156_v11  ;;  %5669 = vmatprep.subr.bf16.mxu0 %v6629_v16  ;;  %v158_v29 = vand.u32 4294901760, %v56_v13  ;;  %v162_v30 = vand.u32 4294901760, %v59_v14  ;;  %v68_v37 = vld [vmem:[#allocation2 + $0x90] sm:$0xff]  ;;  %v71_v38 = vld [vmem:[#allocation2 + $0xa8] sm:$0xff] }
  0x18   :  { %8895 = vst [vmem:[#allocation8_spill] sm:$0xff] %v6637_v23  ;;  %8897 = vst [vmem:[#allocation10_spill] sm:$0xff] %v6646_v28  ;;  %v164_v31 = vand.u32 4294901760, %v63_v15  ;;  %5671 = vmatpush1.bf16.msra.mxu0 %v6637_v23  ;;  %v168_v33 = vand.u32 4294901760, %v66_v20  ;;  %v166_v34 = vand.u32 4294901760, %v62_v21  ;;  %v170_v35 = vand.u32 4294901760, %v65_v22 }
  0x19   :  { %8896 = vst [vmem:[#allocation9_spill] sm:$0xff] %v6641_v25  ;;  %v172_v36 = vand.u32 4294901760, %v69_v27  ;;  %5673 = vmatprep.subr.bf16.mxu0 %v6641_v25  ;;  %v6650_v39 = vpack.c.bf16 %v162_v30, %v158_v29  ;;  %v6652_v40 = vsub.f32 %v56_v13, %v158_v29  ;;  %v6654_v41 = vsub.f32 %v59_v14, %v162_v30  ;;  %v75_v43 = vld [vmem:[#allocation2 + $0xc8] sm:$0xff]  ;;  %v78_v44 = vld [vmem:[#allocation2 + $0xe0] sm:$0xff]  ;;  %v77_v50 = vld [vmem:[#allocation2 + $0xd8] sm:$0xff] }
  0x1a   :  { %v6656_v42 = vsub.f32 %v63_v15, %v164_v31  ;;  %v74_v45 = vld [vmem:[#allocation2 + $0xc0] sm:$0xff]  ;;  %v6658_v46 = vpack.c.bf16 %v168_v33, %v164_v31  ;;  %v6660_v47 = vsub.f32 %v66_v20, %v168_v33  ;;  %v6662_v48 = vpack.c.bf16 %v170_v35, %v166_v34  ;;  %v81_v59 = vld [vmem:[#allocation2 + $0xf8] sm:$0xff]  ;;  %v84_v60 = vld [vmem:[#allocation2 + $0x110] sm:$0xff] }
  0x1b   :  { %8898 = vst [vmem:[#allocation11_spill] sm:$0xff] %v6650_v39  ;;  %8899 = vst [vmem:[#allocation12_spill] sm:$0xff] %v6654_v41  ;;  %v6664_v49 = vsub.f32 %v62_v21, %v166_v34  ;;  %v6666_v51 = vsub.f32 %v65_v22, %v170_v35  ;;  %v176_v52 = vand.u32 4294901760, %v72_v32  ;;  %v6668_v53 = vsub.f32 %v69_v27, %v172_v36  ;;  %v80_v2 = vld [vmem:[#allocation2 + $0xf0] sm:$0xff]  ;;  %v83_v3 = vld [vmem:[#allocation2 + $0x108] sm:$0xff] }
  0x1c   :  { %8900 = vst [vmem:[#allocation13_spill] sm:$0xff] %v6656_v42  ;;  %8901 = vst [vmem:[#allocation14_spill] sm:$0xff] %v6658_v46  ;;  %v174_v54 = vand.u32 4294901760, %v68_v37  ;;  %5675 = vmatpush1.bf16.msra.mxu0 %v6650_v39  ;;  %v178_v55 = vand.u32 4294901760, %v71_v38  ;;  %v180_v56 = vand.u32 4294901760, %v75_v43  ;;  %v184_v57 = vand.u32 4294901760, %v78_v44 }
  0x1d   :  { %8902 = vst [vmem:[#allocation15_spill] sm:$0xff] %v6660_v47  ;;  %8903 = vst [vmem:[#allocation16_spill] sm:$0xff] %v6662_v48  ;;  %v182_v58 = vand.u32 4294901760, %v74_v45  ;;  %5677 = vmatprep.subr.bf16.mxu0 %v6658_v46  ;;  %v6672_v61 = vpack.c.bf16 %v176_v52, %v172_v36  ;;  %v6674_v62 = vsub.f32 %v72_v32, %v176_v52  ;;  %v186_v1 = vand.u32 4294901760, %v77_v50  ;;  %v87_v4 = vld [vmem:[#allocation2 + $0x128] sm:$0xf] }
  0x1e   :  { %8904 = vst [vmem:[#allocation17_spill] sm:$0xff] %v6664_v49  ;;  %8905 = vst [vmem:[#allocation18_spill] sm:$0xff] %v6666_v51  ;;  %v6676_v63 = vsub.f32 %v68_v37, %v174_v54  ;;  %v6678_v5 = vpack.c.bf16 %v178_v55, %v174_v54  ;;  %v6680_v6 = vsub.f32 %v71_v38, %v178_v55  ;;  %v88_v9 = vld [vmem:[#allocation2 + $0x130] sm:$0xf]  ;;  %v86_v10 = vld [vmem:[#allocation2 + $0x120] sm:$0xf] }
  0x1f   :  { %8906 = vst [vmem:[#allocation19_spill] sm:$0xff] %v6668_v53  ;;  %8907 = vst [vmem:[#allocation20_spill] sm:$0xff] %v6672_v61  ;;  %v6682_v7 = vpack.c.bf16 %v184_v57, %v180_v56  ;;  %v6684_v8 = vsub.f32 %v75_v43, %v180_v56  ;;  %v34_v11 = vld [vmem:[%s8673_s0] sm:$0xff]  ;;  %v6689_v12 = vsub.f32 %v78_v44, %v184_v57  ;;  %v188_v20 = vand.u32 4294901760, %v81_v59  ;;  %v35_v37 = vld [vmem:[%s8673_s0 + $0x8] sm:$0xff] }
  0x20   :  { %8908 = vst [vmem:[#allocation21_spill] sm:$0xff] %v6674_v62  ;;  %8909 = vst [vmem:[#allocation22_spill] sm:$0xff] %v6676_v63  ;;  %v6691_v13 = vpack.c.bf16 %v186_v1, %v182_v58  ;;  %v6693_v14 = vsub.f32 %v74_v45, %v182_v58  ;;  %v6695_v15 = vsub.f32 %v77_v50, %v186_v1  ;;  %5679 = vmatpush1.bf16.msra.mxu0 %v6662_v48  ;;  %v6718_v38 = vld [vmem:[#allocation2 + $0x10] sm:$0xff]  ;;  %v6737_v57 = vld [vmem:[#allocation2 + $0x28] sm:$0xff]  ;;  %vm4607_vm2 = vcmask 15360  }
  0x21   :  { %8910 = vst [vmem:[#allocation23_spill] sm:$0xff] %v6678_v5  ;;  %8911 = vst [vmem:[#allocation24_spill] sm:$0xff] %v6680_v6  ;;  %v192_v21 = vand.u32 4294901760, %v84_v60  ;;  %v190_v22 = vand.u32 4294901760, %v80_v2  ;;  %v194_v27 = vand.u32 4294901760, %v83_v3  ;;  %5681 = vmatprep.subr.bf16.mxu0 %v6672_v61  ;;  %v6700_v29 = vsel %vm138_vm0, %v87_v4, 0 }
  0x22   :  { %8912 = vst [vmem:[#allocation25_spill] sm:$0xff] %v6682_v7  ;;  %8913 = vst [vmem:[#allocation26_spill] sm:$0xff] %v6684_v8  ;;  %v6703_v30 = vsel %vm138_vm0, %v88_v9, 0  ;;  %v140_v31 = vsel %vm138_vm0, %v86_v10, 0  ;;  %v91_v32 = vsel %vm89_vm1, %v34_v11, 0  ;;  %v6709_v34 = vsub.f32 %v81_v59, %v188_v20  ;;  %v6827_v46 = vld [vmem:[#allocation2 + $0x70] sm:$0xff] }
  0x23   :  { %8914 = vst [vmem:[#allocation27_spill] sm:$0xff] %v6689_v12  ;;  %8915 = vst [vmem:[#allocation28_spill] sm:$0xff] %v6691_v13  ;;  %v6707_v33 = vpack.c.bf16 %v192_v21, %v188_v20  ;;  %v6711_v35 = vsub.f32 %v84_v60, %v192_v21  ;;  %v6713_v36 = vpack.c.bf16 %v194_v27, %v190_v22  ;;  %v6725_v45 = vand.u32 4294901760, %v6700_v29  ;;  %v6829_v39 = vld [vmem:[#allocation2 + $0x88] sm:$0xff] }
  0x24   :  { %8916 = vst [vmem:[#allocation29_spill] sm:$0xff] %v6693_v14  ;;  %8917 = vst [vmem:[#allocation30_spill] sm:$0xff] %v6695_v15  ;;  %v6720_v43 = vsub.f32 %v80_v2, %v190_v22  ;;  %v6722_v44 = vsub.f32 %v83_v3, %v194_v27  ;;  %v6728_v50 = vand.u32 4294901760, %v6703_v30  ;;  %5683 = vmatpush1.bf16.msra.mxu0 %v6678_v5  ;;  %v6731_v52 = vand.u32 4294901760, %v140_v31  ;;  %v36_v2 = vld [vmem:[%s8673_s0 + $0x10] sm:$0xff] }
  0x25   :  { %8918 = vst [vmem:[#allocation31_spill] sm:$0xff] %v6707_v33  ;;  %8919 = vst [vmem:[#allocation32_spill] sm:$0xff] %v6709_v34  ;;  %v6733_v54 = vand.u32 4294901760, %v91_v32  ;;  %v8681_v55 = vand.u32 4294901760, %v6631_v17  ;;  %v8680_v56 = vand.u32 4294901760, %v6633_v18  ;;  %5685 = vmatprep.subr.bf16.mxu0 %v6682_v7  ;;  %v8679_v58 = vand.u32 4294901760, %v6635_v19 }
  0x26   :  { %8920 = vst [vmem:[#allocation33_spill] sm:$0xff] %v6711_v35  ;;  %8921 = vst [vmem:[#allocation34_spill] sm:$0xff] %v6713_v36  ;;  %v8682_v59 = vand.u32 4294901760, %v6639_v24  ;;  %v94_v60 = vsel %vm89_vm1, %v35_v37, 0  ;;  %v8688_v1 = vand.u32 4294901760, %v6718_v38  ;;  %v6748_v3 = vsub.f32 %v140_v31, %v6731_v52 }
  0x27   :  { %8922 = vst [vmem:[#allocation35_spill] sm:$0xff] %v6720_v43  ;;  %8923 = vst [vmem:[#allocation36_spill] sm:$0xff] %v6722_v44  ;;  %v6751_v4 = vsub.f32 %v91_v32, %v6733_v54  ;;  %v418_v9 = vsub.f32 %v6631_v17, %v8681_v55  ;;  %v430_v10 = vsub.f32 %v6633_v18, %v8680_v56  ;;  %v6765_v21 = vand.u32 4294901760, %v94_v60 }
  0x28   :  { %8924 = vst [vmem:[#allocation37_spill] sm:$0xff] %v6725_v45  ;;  %8925 = vst [vmem:[#allocation38_spill] sm:$0xff] %v6731_v52  ;;  %v424_v11 = vsub.f32 %v6635_v19, %v8679_v58  ;;  %v436_v20 = vsub.f32 %v6639_v24, %v8682_v59  ;;  %v8687_v22 = vand.u32 4294901760, %v6737_v57  ;;  %5687 = vmatpush1.bf16.msra.mxu0 %v6691_v13  ;;  %v97_v37 = vsel %vm89_vm1, %v36_v2, 0 }
  0x29   :  { %8926 = vst [vmem:[#allocation39_spill] sm:$0xff] %v6733_v54  ;;  %8927 = vst [vmem:[#allocation40_spill] sm:$0xff] %v6748_v3  ;;  %v6770_v27 = vand.u32 4294901760, %v6751_v4  ;;  %v419_v31 = vand.u32 4294901760, %v418_v9  ;;  %v431_v32 = vand.u32 4294901760, %v430_v10  ;;  %5689 = vmatprep.subr.bf16.mxu0 %v6707_v33  ;;  %v6775_v55 = vsub.f32 %v94_v60, %v6765_v21  ;;  %v6788_v33 = vld [vmem:[#allocation2 + $0x40] sm:$0xff] }
  0x2a   :  { %8928 = vst [vmem:[#allocation41_spill] sm:$0xff] %v6751_v4  ;;  %8929 = vst [vmem:[#allocation42_spill] sm:$0xff] %v6765_v21  ;;  %v425_v58 = vand.u32 4294901760, %v424_v11  ;;  %v437_v56 = vand.u32 4294901760, %v436_v20  ;;  %v6781_v59 = vpack.c.bf16 %v8687_v22, %v8688_v1  ;;  %v6785_v10 = vand.u32 4294901760, %v97_v37  ;;  %v6796_v1 = vld [vmem:[#allocation2 + $0x58] sm:$0xff] }
  0x2b   :  { %8930 = vst [vmem:[#allocation43_spill] sm:$0xff] %v6770_v27  ;;  %8931 = vst [vmem:[#allocation44_spill] sm:$0xff] %v6775_v55  ;;  %v242_v0 = vsub.f32 %v6751_v4, %v6770_v27  ;;  %v5692_v9 = vpack.c.bf16 %v431_v32, %v419_v31  ;;  %v8693_v2 = vand.u32 4294901760, %v6643_v26  ;;  %v6791_v60 = vand.u32 4294901760, %v6775_v55  ;;  %v37_v22 = vld [vmem:[%s8673_s0 + $0x18] sm:$0xff] }
  0x2c   :  { %8932 = vst [vmem:[#allocation45_spill] sm:$0xff] %v6781_v59  ;;  %8933 = vst [vmem:[#allocation46_spill] sm:$0xff] %v6785_v10  ;;  %v5694_v11 = vpack.c.bf16 %v437_v56, %v425_v58  ;;  %5813 = vmatprep.subr.bf16.mxu1 %v6781_v59  ;;  %v8706_v20 = vand.u32 4294901760, %v6646_v28  ;;  %5691 = vmatpush1.bf16.msra.mxu0 %v6713_v36  ;;  %v6800_v32 = vsub.f32 %v97_v37, %v6785_v10 }
  0x2d   :  { %8934 = vst [vmem:[#allocation47_spill] sm:$0xff] %v6791_v60  ;;  %v243_v31 = vand.u32 4294901760, %v242_v0  ;;  %5815 = vmatpush3.bf16.msra.mxu1 %v6781_v59  ;;  %v442_v56 = vsub.f32 %v6643_v26, %v8693_v2  ;;  %197 = vmatprep.subr.mxu0 %v6725_v45  ;;  %v253_v0 = vsub.f32 %v6775_v55, %v6791_v60  ;;  %v8936_v36 = vand.u32 4294901760, %v6652_v40 }
  0x2e   :  { %8935 = vst [vmem:[#allocation48_spill] sm:$0xff] %v6800_v32  ;;  %v454_v37 = vsub.f32 %v6646_v28, %v8706_v20  ;;  %v6821_v58 = vand.u32 4294901760, %v6800_v32  ;;  %v8938_v5 = vand.u32 4294901760, %v6654_v41  ;;  %v8939_v23 = vand.u32 4294901760, %v6788_v33 }
  0x2f   :  { %v448_v13 = vsub.f32 %v6652_v40, %v8936_v36  ;;  %v443_v7 = vand.u32 4294901760, %v442_v56  ;;  %v38_v36 = vld [vmem:[%s8673_s0 + $0x20] sm:$0xff]  ;;  %5058 = vmatprep.mubr.f32.mxu1 %v243_v31  ;;  %v6834_v20 = vand.u32 4294901760, %v253_v0  ;;  %v100_v56 = vsel %vm89_vm1, %v37_v22, 0 }
  0x30   :  { %8937 = vst [vmem:[#allocation49_spill] sm:$0xff] %v6821_v58  ;;  %v460_v61 = vsub.f32 %v6654_v41, %v8938_v5  ;;  %v455_v2 = vand.u32 4294901760, %v454_v37  ;;  %199 = vmatpush1.msra.mxu0 %v6731_v52  ;;  %v264_v5 = vsub.f32 %v6800_v32, %v6821_v58  ;;  %v8940_v60 = vand.u32 4294901760, %v6796_v1  ;;  %v6848_v0 = vld [vmem:[#allocation2 + $0xa0] sm:$0xff] }
  0x31   :  { %v449_v25 = vand.u32 4294901760, %v448_v13  ;;  %v6846_v55 = vand.u32 4294901760, %v100_v56  ;;  %244 = vmatmul.mubr.f32.vlgmr.msra.gmra.mrb[0].mxu0 %v243_v31  ;;  %5693 = vmatprep.subr.bf16.mxu0 %v5692_v9  ;;  %v8722_v22 = vand.u32 4294901760, %v6827_v46  ;;  %v8721_v37 = vand.u32 4294901760, %v6829_v39 }
  0x32   :  { %v461_v48 = vand.u32 4294901760, %v460_v61  ;;  %v6844_v27 = vpack.c.bf16 %v8940_v60, %v8939_v23  ;;  %v5696_v13 = vpack.c.bf16 %v455_v2, %v443_v7  ;;  %v103_v52 = vsel %vm89_vm1, %v38_v36, 0  ;;  %v6853_v61 = vld [vmem:[#allocation2 + $0xb8] sm:$0xff]  ;;  %v39_v23 = vld [vmem:[%s8673_s0 + $0x28] sm:$0xff]  ;;  %5695 = vmatpush1.bf16.msra.mxu0 %v5694_v11 }
  0x33   :  { %8942 = vst [vmem:[#allocation51_spill] sm:$0xff] %v6846_v55  ;;  %v8943_v60 = vmov 0.0   ;;  %v6859_v58 = vand.u32 4294901760, %v264_v5  ;;  %v6862_v7 = vsub.f32 %v100_v56, %v6846_v55  ;;  %v6864_v9 = vand.u32 4294901760, %v103_v52  ;;  %v6922_v55 = vld [vmem:[#allocation2 + $0x100] sm:$0xff] }
  0x34   :  { %8941 = vst [vmem:[#allocation50_spill] sm:$0xff] %v6844_v27  ;;  %249 = vmatprep.mubr.f32.mxu0 %v8943_v60  ;;  %v5698_v31 = vpack.c.bf16 %v461_v48, %v449_v25  ;;  %5697 = vmatprep.subr.bf16.mxu0 %v5696_v13  ;;  %v6871_v2 = vpack.c.bf16 %v8721_v37, %v8722_v22  ;;  %v8725_v11 = vand.u32 4294901760, %v6656_v42  ;;  %v8728_v36 = vand.u32 4294901760, %v6660_v47 }
  0x35   :  { %8944 = vst [vmem:[#allocation52_spill] sm:$0xff] %v6862_v7  ;;  %8945 = vst [vmem:[#allocation53_spill] sm:$0xff] %v6864_v9  ;;  %5817 = vmatprep.subr.bf16.mxu1 %v6844_v27  ;;  %v6877_v48 = vand.u32 4294901760, %v6862_v7  ;;  %v6881_v56 = vsub.f32 %v103_v52, %v6864_v9  ;;  %v106_v13 = vsel %vm89_vm1, %v39_v23, 0  ;;  %255 = vmatmul.mubr.f32.gmra.mrb[2].mxu0 %v6834_v20  ;;  %v8952_v32 = vand.u32 4294901760, %v6853_v61  ;;  %v6911_v52 = vld [vmem:[#allocation2 + $0xe8] sm:$0xff] }
  0x36   :  { %8946 = vst [vmem:[#allocation54_spill] sm:$0xff] %v6871_v2  ;;  %5819 = vmatpush3.bf16.msra.mxu1 %v6844_v27  ;;  %v466_v37 = vsub.f32 %v6656_v42, %v8725_v11  ;;  %v478_v22 = vsub.f32 %v6660_v47, %v8728_v36  ;;  %v6893_v25 = vand.u32 4294901760, %v106_v13  ;;  %v6896_v27 = vld [vmem:[#allocation2 + $0xd0] sm:$0xff]  ;;  %260 = vmatprep.mubr.f32.mxu0 %v8943_v60  ;;  %v8951_v11 = vand.u32 4294901760, %v6848_v0 }
  0x37   :  { %8947 = vst [vmem:[#allocation55_spill] sm:$0xff] %v6877_v48  ;;  %8948 = vst [vmem:[#allocation56_spill] sm:$0xff] %v6881_v56  ;;  %5821 = vmatprep.subr.bf16.mxu1 %v6871_v2  ;;  %5699 = vmatpush1.bf16.msra.mxu0 %v5698_v31  ;;  %v275_v23 = vsub.f32 %v6862_v7, %v6877_v48  ;;  %v6902_v5 = vand.u32 4294901760, %v6881_v56  ;;  %v8749_v4 = vand.u32 4294901760, %v6666_v51  ;;  %v8955_v48 = vand.u32 4294901760, %v6664_v49  ;;  %v40_v9 = vld [vmem:[%s8673_s0 + $0x30] sm:$0xff] }
  0x38   :  { %8949 = vst [vmem:[#allocation57_spill] sm:$0xff] %v6893_v25  ;;  %v6908_v36 = vpack.c.bf16 %v8952_v32, %v8951_v11  ;;  %v467_v16 = vand.u32 4294901760, %v466_v37  ;;  %v479_v59 = vand.u32 4294901760, %v478_v22  ;;  %v6914_v31 = vsub.f32 %v106_v13, %v6893_v25 }
  0x39   :  { %8950 = vst [vmem:[#allocation58_spill] sm:$0xff] %v6902_v5  ;;  %v472_v7 = vsub.f32 %v6664_v49, %v8955_v48  ;;  %v6924_v32 = vand.u32 4294901760, %v275_v23  ;;  %v286_v11 = vsub.f32 %v6881_v56, %v6902_v5  ;;  %v484_v22 = vsub.f32 %v6666_v51, %v8749_v4  ;;  %v6933_v48 = vld [vmem:[#allocation2 + $0x118] sm:$0xff]  ;;  %266 = vmatmul.mubr.f32.gmra.mrb[4].mxu0 %v6859_v58 }
  0x3a   :  { %8953 = vst [vmem:[#allocation59_spill] sm:$0xff] %v6908_v36  ;;  %8954 = vst [vmem:[#allocation60_spill] sm:$0xff] %v6914_v31  ;;  %5823 = vmatpush3.bf16.msra.mxu1 %v6871_v2  ;;  %v5700_v13 = vpack.c.bf16 %v479_v59, %v467_v16  ;;  %v6938_v23 = vand.u32 4294901760, %v6914_v31  ;;  %v8758_v5 = vand.u32 4294901760, %v6911_v52  ;;  %v41_v2 = vld [vmem:[%s8673_s0 + $0x38] sm:$0xff]  ;;  %271 = vmatprep.mubr.f32.mxu0 %v8943_v60  ;;  %v109_v56 = vsel %vm89_vm1, %v40_v9, 0 }
  0x3b   :  { %5825 = vmatprep.subr.bf16.mxu1 %v6908_v36  ;;  %v473_v25 = vand.u32 4294901760, %v472_v7  ;;  %v6945_v4 = vand.u32 4294901760, %v286_v11  ;;  %v485_v37 = vand.u32 4294901760, %v484_v22  ;;  %v8957_v7 = vand.u32 4294901760, %v6896_v27  ;;  %v42_v16 = vld [vmem:[%s8673_s0 + $0x40] sm:$0xff] }
  0x3c   :  { %8956 = vst [vmem:[#allocation61_spill] sm:$0xff] %v6938_v23  ;;  %5701 = vmatprep.subr.bf16.mxu0 %v5700_v13  ;;  %v297_v59 = vsub.f32 %v6914_v31, %v6938_v23  ;;  %v6957_v21 = vand.u32 4294901760, %v109_v56  ;;  %v8765_v11 = vand.u32 4294901760, %v6933_v48  ;;  %v112_v9 = vsel %vm89_vm1, %v41_v2, 0 }
  0x3d   :  { %v6955_v10 = vpack.c.bf16 %v8758_v5, %v8957_v7  ;;  %v5702_v54 = vpack.c.bf16 %v485_v37, %v473_v25  ;;  %v8768_v22 = vand.u32 4294901760, %v6668_v53  ;;  %v43_v7 = vld [vmem:[%s8673_s0 + $0x48] sm:$0xff]  ;;  %277 = vmatmul.mubr.f32.gmra.mrb[6].mxu0 %v6924_v32  ;;  %v8961_v25 = vand.u32 4294901760, %v6922_v55 }
  0x3e   :  { %8959 = vst [vmem:[#allocation63_spill] sm:$0xff] %v6957_v21  ;;  %5827 = vmatpush3.bf16.msra.mxu1 %v6908_v36  ;;  %v6971_v5 = vand.u32 4294901760, %v297_v59  ;;  %v6975_v2 = vsub.f32 %v109_v56, %v6957_v21  ;;  %v6983_v13 = vand.u32 4294901760, %v112_v9  ;;  %282 = vmatprep.mubr.f32.mxu0 %v8943_v60  ;;  %v8964_v23 = vand.u32 4294901760, %v6674_v62 }
  0x3f   :  { %8958 = vst [vmem:[#allocation62_spill] sm:$0xff] %v6955_v10  ;;  %5829 = vmatprep.subr.bf16.mxu1 %v6955_v10  ;;  %v6981_v37 = vpack.c.bf16 %v8765_v11, %v8961_v25  ;;  %5703 = vmatpush1.bf16.msra.mxu0 %v5702_v54  ;;  %v490_v59 = vsub.f32 %v6668_v53, %v8768_v22  ;;  %v8773_v36 = vand.u32 4294901760, %v6676_v63  ;;  %v8776_v31 = vand.u32 4294901760, %v6680_v6 }
  0x40   :  { %8960 = vst [vmem:[#allocation64_spill] sm:$0xff] %v6975_v2  ;;  %8963 = vst [vmem:[#allocation66_spill] sm:$0xff] %v6983_v13  ;;  %v502_v56 = vsub.f32 %v6674_v62, %v8964_v23  ;;  %v6995_v25 = vand.u32 4294901760, %v6975_v2  ;;  %v6998_v11 = vsub.f32 %v112_v9, %v6983_v13  ;;  %v115_v54 = vsel %vm89_vm1, %v42_v16, 0 }
  0x41   :  { %8962 = vst [vmem:[#allocation65_spill] sm:$0xff] %v6981_v37  ;;  %v118_v21 = vsel %vm89_vm1, %v43_v7, 0  ;;  %v491_v22 = vand.u32 4294901760, %v490_v59  ;;  %v496_v23 = vsub.f32 %v6676_v63, %v8773_v36  ;;  %v508_v62 = vsub.f32 %v6680_v6, %v8776_v31  ;;  %288 = vmatmul.mubr.f32.gmra.mrb[8].mxu0 %v6945_v4 }
  0x42   :  { %8965 = vst [vmem:[#allocation67_spill] sm:$0xff] %v6995_v25  ;;  %8966 = vst [vmem:[#allocation68_spill] sm:$0xff] %v6998_v11  ;;  %5831 = vmatpush3.bf16.msra.mxu1 %v6955_v10  ;;  %v503_v53 = vand.u32 4294901760, %v502_v56  ;;  %v308_v9 = vsub.f32 %v6975_v2, %v6995_v25  ;;  %v7014_v16 = vand.u32 4294901760, %v6998_v11  ;;  %v7016_v7 = vand.u32 4294901760, %v115_v54  ;;  %293 = vmatprep.mubr.f32.mxu0 %v8943_v60 }
  0x43   :  { %5833 = vmatprep.subr.bf16.mxu1 %v6981_v37  ;;  %v7018_v59 = vand.u32 4294901760, %v118_v21  ;;  %v497_v36 = vand.u32 4294901760, %v496_v23  ;;  %v509_v10 = vand.u32 4294901760, %v508_v62  ;;  %v8787_v31 = vand.u32 4294901760, %v6684_v8 }
  0x44   :  { %8967 = vst [vmem:[#allocation69_spill] sm:$0xff] %v7014_v16  ;;  %v5704_v56 = vpack.c.bf16 %v503_v53, %v491_v22  ;;  %v7022_v13 = vand.u32 4294901760, %v308_v9  ;;  %v319_v25 = vsub.f32 %v6998_v11, %v7014_v16  ;;  %v7027_v2 = vsub.f32 %v115_v54, %v7016_v7 }
  0x45   :  { %v7030_v6 = vsub.f32 %v118_v21, %v7018_v59  ;;  %v5706_v63 = vpack.c.bf16 %v509_v10, %v497_v36  ;;  %v514_v53 = vsub.f32 %v6684_v8, %v8787_v31  ;;  %v8792_v62 = vand.u32 4294901760, %v6689_v12  ;;  %299 = vmatmul.mubr.f32.gmra.mrb[10].mxu0 %v6971_v5  ;;  %v44_v36 = vld [vmem:[%s8673_s0 + $0x50] sm:$0xff] }
  0x46   :  { %8968 = vst [vmem:[#allocation70_spill] sm:$0xff] %v7027_v2  ;;  %5705 = vmatprep.subr.bf16.mxu0 %v5704_v56  ;;  %5835 = vmatpush3.bf16.msra.mxu1 %v6981_v37  ;;  %v8795_v22 = vand.u32 4294901760, %v6693_v14  ;;  %v7039_v23 = vand.u32 4294901760, %v319_v25  ;;  %v7043_v21 = vand.u32 4294901760, %v7027_v2  ;;  %v8972_v31 = vand.u32 4294901760, %v6718_v38 }
  0x47   :  { %8969 = vst [vmem:[#allocation71_spill] sm:$0xff] %v7030_v6  ;;  %5056 = vmatprep.subr.mxu1 %v6728_v50  ;;  %v7046_v54 = vand.u32 4294901760, %v7030_v6  ;;  %304 = vmatprep.mubr.f32.mxu0 %v8943_v60  ;;  %v515_v9 = vand.u32 4294901760, %v514_v53  ;;  %v526_v25 = vsub.f32 %v6689_v12, %v8792_v62  ;;  %v8973_v53 = vand.u32 4294901760, %v6695_v15 }
  0x48   :  { %8970 = vst [vmem:[#allocation72_spill] sm:$0xff] %v7043_v21  ;;  %5707 = vmatpush1.bf16.msra.mxu0 %v5706_v63  ;;  %v520_v56 = vsub.f32 %v6693_v14, %v8795_v22  ;;  %v7062_v10 = vsub.f32 %v6718_v38, %v8972_v31  ;;  %v330_v16 = vsub.f32 %v7027_v2, %v7043_v21  ;;  %v8974_v62 = vand.u32 4294901760, %v6737_v57 }
  0x49   :  { %8971 = vst [vmem:[#allocation73_spill] sm:$0xff] %v7046_v54  ;;  %v341_v63 = vsub.f32 %v7030_v6, %v7046_v54  ;;  %v532_v37 = vsub.f32 %v6695_v15, %v8973_v53  ;;  %v527_v22 = vand.u32 4294901760, %v526_v25  ;;  %v121_v21 = vsel %vm89_vm1, %v44_v36, 0  ;;  %v45_v54 = vld [vmem:[%s8673_s0 + $0x58] sm:$0xff]  ;;  %310 = vmatmul.mubr.f32.gmra.mrb[12].mxu0 %v7022_v13 }
  0x4a   :  { %v7074_v11 = vsub.f32 %v6737_v57, %v8974_v62  ;;  %5057 = vmatpush3.msra.mxu1 %v6728_v50  ;;  %v521_v38 = vand.u32 4294901760, %v520_v56  ;;  %v8804_v31 = vand.u32 4294901760, %v7062_v10  ;;  %v7083_v53 = vand.u32 4294901760, %v330_v16  ;;  %315 = vmatprep.mubr.f32.mxu0 %v8943_v60 }
  0x4b   :  { %5059 = vmatmul.mubr.f32.vlgmr.msra.gmra.mrb[0].mxu1 %v6834_v20  ;;  %v7086_v57 = vand.u32 4294901760, %v341_v63  ;;  %v533_v62 = vand.u32 4294901760, %v532_v37  ;;  %v5708_v36 = vpack.c.bf16 %v527_v22, %v515_v9  ;;  %v7094_v6 = vand.u32 4294901760, %v121_v21 }
  0x4c   :  { %v8806_v25 = vand.u32 4294901760, %v7074_v11  ;;  %5061 = vmatprep.mubr.f32.mxu1 %v6859_v58  ;;  %v1902_v56 = vsub.f32 %v7062_v10, %v8804_v31  ;;  %v8975_v16 = vand.u32 4294901760, %v6788_v33  ;;  %v8976_v2 = vand.u32 4294901760, %v6796_v1 }
  0x4d   :  { %v5710_v63 = vpack.c.bf16 %v533_v62, %v521_v38  ;;  %v124_v22 = vsel %vm89_vm1, %v45_v54, 0  ;;  %5709 = vmatprep.subr.bf16.mxu0 %v5708_v36  ;;  %v7111_v31 = vsub.f32 %v121_v21, %v7094_v6  ;;  %321 = vmatmul.mubr.f32.gmra.mrb[14].mxu0 %v7039_v23 }
  0x4e   :  { %v7099_v20 = vsub.f32 %v6788_v33, %v8975_v16  ;;  %v1909_v37 = vsub.f32 %v7074_v11, %v8806_v25  ;;  %v7107_v58 = vsub.f32 %v6796_v1, %v8976_v2  ;;  %v1903_v9 = vand.u32 4294901760, %v1902_v56  ;;  %326 = vmatprep.mubr.f32.mxu0 %v8943_v60 }
  0x4f   :  { %8977 = vst [vmem:[#allocation74_spill] sm:$0xff] %v7111_v31  ;;  %v7114_v16 = vand.u32 4294901760, %v124_v22  ;;  %5062 = vmatmul.mubr.f32.gmra.mrb[2].mxu1 %v6924_v32  ;;  %v8807_v1 = vand.u32 4294901760, %v6709_v34  ;;  %v8811_v2 = vand.u32 4294901760, %v6711_v35  ;;  %5711 = vmatpush1.bf16.msra.mxu0 %v5710_v63  ;;  %v7123_v21 = vand.u32 4294901760, %v7111_v31 }
  0x50   :  { %v8805_v33 = vand.u32 4294901760, %v7099_v20  ;;  %v1910_v38 = vand.u32 4294901760, %v1909_v37  ;;  %v8808_v62 = vand.u32 4294901760, %v7107_v58  ;;  %v8814_v32 = vand.u32 4294901760, %v6720_v43  ;;  %5064 = vmatprep.mubr.f32.mxu1 %v6945_v4 }
  0x51   :  { %8978 = vst [vmem:[#allocation75_spill] sm:$0xff] %v7114_v16  ;;  %8979 = vst [vmem:[#allocation76_spill] sm:$0xff] %v7123_v21  ;;  %v7129_v36 = vsub.f32 %v124_v22, %v7114_v16  ;;  %v538_v63 = vsub.f32 %v6709_v34, %v8807_v1  ;;  %v352_v22 = vsub.f32 %v7111_v31, %v7123_v21  ;;  %332 = vmatmul.mubr.f32.gmra.mrb[16].mxu0 %v7083_v53 }
  0x52   :  { %v1916_v54 = vsub.f32 %v7099_v20, %v8805_v33  ;;  %v5836_v56 = vpack.c.bf16 %v1910_v38, %v1903_v9  ;;  %v1923_v37 = vsub.f32 %v7107_v58, %v8808_v62  ;;  %v550_v33 = vsub.f32 %v6711_v35, %v8811_v2  ;;  %v46_v2 = vld [vmem:[%s8673_s0 + $0x60] sm:$0xff]  ;;  %337 = vmatprep.mubr.f32.mxu0 %v8943_v60 }
  0x53   :  { %v7145_v9 = vand.u32 4294901760, %v7129_v36  ;;  %v544_v4 = vsub.f32 %v6720_v43, %v8814_v32  ;;  %v539_v1 = vand.u32 4294901760, %v538_v63  ;;  %v8821_v16 = vand.u32 4294901760, %v6722_v44  ;;  %5065 = vmatmul.mubr.f32.gmra.mrb[4].mxu1 %v6971_v5 }
  0x54   :  { %v1917_v25 = vand.u32 4294901760, %v1916_v54  ;;  %5837 = vmatprep.subr.bf16.mxu1 %v5836_v56  ;;  %v1924_v38 = vand.u32 4294901760, %v1923_v37  ;;  %v551_v62 = vand.u32 4294901760, %v550_v33  ;;  %v353_v54 = vand.u32 4294901760, %v352_v22  ;;  %5067 = vmatprep.mubr.f32.mxu1 %v7022_v13 }
  0x55   :  { %8980 = vst [vmem:[#allocation77_spill] sm:$0xff] %v7145_v9  ;;  %5839 = vmatpush3.bf16.msra.mxu1 %v5836_v56  ;;  %v363_v21 = vsub.f32 %v7129_v36, %v7145_v9  ;;  %v545_v32 = vand.u32 4294901760, %v544_v4  ;;  %v8981_v31 = vand.u32 4294901760, %v6827_v46  ;;  %v556_v43 = vsub.f32 %v6722_v44, %v8821_v16  ;;  %v47_v4 = vld [vmem:[%s8673_s0 + $0x68] sm:$0xff]  ;;  %343 = vmatmul.mubr.f32.gmra.mrb[18].mxu0 %v7086_v57 }
  0x56   :  { %v5840_v33 = vpack.c.bf16 %v1924_v38, %v1917_v25  ;;  %v5712_v63 = vpack.c.bf16 %v551_v62, %v539_v1  ;;  %v8982_v22 = vand.u32 4294901760, %v6829_v39  ;;  %v127_v5 = vsel %vm89_vm1, %v46_v2, 0  ;;  %348 = vmatprep.mubr.f32.mxu0 %v8943_v60 }
  0x57   :  { %v7161_v37 = vsub.f32 %v6827_v46, %v8981_v31  ;;  %v7175_v9 = vand.u32 4294901760, %v363_v21  ;;  %v8983_v31 = vand.u32 4294901760, %v6848_v0  ;;  %v7187_v1 = vand.u32 4294901760, %v127_v5  ;;  %5068 = vmatmul.mubr.f32.gmra.mrb[6].mxu1 %v7039_v23 }
  0x58   :  { %v7170_v56 = vsub.f32 %v6829_v39, %v8982_v22  ;;  %5841 = vmatprep.subr.bf16.mxu1 %v5840_v33  ;;  %v557_v39 = vand.u32 4294901760, %v556_v43  ;;  %v8984_v21 = vand.u32 4294901760, %v6853_v61  ;;  %v130_v43 = vsel %vm89_vm1, %v47_v4, 0  ;;  %5713 = vmatprep.subr.bf16.mxu0 %v5712_v63 }
  0x59   :  { %v8825_v46 = vand.u32 4294901760, %v7161_v37  ;;  %v7183_v25 = vsub.f32 %v6848_v0, %v8983_v31  ;;  %5843 = vmatpush3.bf16.msra.mxu1 %v5840_v33  ;;  %v7202_v38 = vsub.f32 %v6700_v29, %v6725_v45  ;;  %v7209_v22 = vsub.f32 %v127_v5, %v7187_v1  ;;  %5070 = vmatprep.mubr.f32.mxu1 %v7083_v53 }
  0x5a   :  { %v8824_v62 = vand.u32 4294901760, %v7170_v56  ;;  %v7192_v13 = vsub.f32 %v6853_v61, %v8984_v21  ;;  %v5714_v61 = vpack.c.bf16 %v557_v39, %v545_v32  ;;  %v7216_v4 = vand.u32 4294901760, %v130_v43  ;;  %354 = vmatmul.mubr.f32.gmra.mrb[20].mxu0 %v353_v54 }
  0x5b   :  { %v1930_v0 = vsub.f32 %v7161_v37, %v8825_v46  ;;  %v8823_v2 = vand.u32 4294901760, %v7183_v25  ;;  %8985 = vst [vmem:[#allocation78_spill] sm:$0xff] %v7202_v38  ;;  %v8826_v23 = vand.u32 4294901760, %v7202_v38  ;;  %v7220_v63 = vand.u32 4294901760, %v7209_v22  ;;  %359 = vmatprep.mubr.f32.mxu0 %v8943_v60  ;;  %5071 = vmatmul.mubr.f32.gmra.mrb[8].mxu1 %v7086_v57 }
  0x5c   :  { %v1937_v33 = vsub.f32 %v7170_v56, %v8824_v62  ;;  %v8822_v31 = vand.u32 4294901760, %v7192_v13  ;;  %v8987_v39 = vand.u32 4294901760, %v6896_v27  ;;  %5715 = vmatpush1.bf16.msra.mxu0 %v5714_v61  ;;  %v7235_v16 = vsub.f32 %v130_v43, %v7216_v4  ;;  %5073 = vmatprep.mubr.f32.mxu1 %v353_v54 }
  0x5d   :  { %v1931_v21 = vand.u32 4294901760, %v1930_v0  ;;  %v1944_v29 = vsub.f32 %v7183_v25, %v8823_v2  ;;  %8986 = vst [vmem:[#allocation79_spill] sm:$0xff] %v7220_v63  ;;  %v48_v0 = vld [vmem:[%s8673_s0 + $0x70] sm:$0xff]  ;;  %v8988_v2 = vand.u32 4294901760, %v6911_v52  ;;  %v374_v62 = vsub.f32 %v7209_v22, %v7220_v63 }
  0x5e   :  { %v1938_v32 = vand.u32 4294901760, %v1937_v33  ;;  %v1951_v5 = vsub.f32 %v7192_v13, %v8822_v31  ;;  %v7228_v53 = vsub.f32 %v6896_v27, %v8987_v39  ;;  %v562_v31 = vsub.f32 %v7202_v38, %v8826_v23  ;;  %365 = vmatmul.mubr.f32.gmra.mrb[22].mxu0 %v7175_v9 }
  0x5f   :  { %v1945_v33 = vand.u32 4294901760, %v1944_v29  ;;  %v7243_v27 = vsub.f32 %v6911_v52, %v8988_v2  ;;  %v7250_v43 = vand.u32 4294901760, %v7235_v16  ;;  %v133_v45 = vsel %vm89_vm1, %v48_v0, 0  ;;  %v49_v52 = vld [vmem:[%s8673_s0 + $0x78] sm:$0xff]  ;;  %370 = vmatprep.mubr.f32.mxu0 %v8943_v60  ;;  %5074 = vmatmul.mubr.f32.gmra.mrb[10].mxu1 %v7175_v9 }
  0x60   :  { %v5844_v39 = vpack.c.bf16 %v1938_v32, %v1931_v21  ;;  %v1952_v61 = vand.u32 4294901760, %v1951_v5  ;;  %v8829_v29 = vand.u32 4294901760, %v7228_v53  ;;  %v563_v46 = vand.u32 4294901760, %v562_v31 }
  0x61   :  { %8989 = vst [vmem:[#allocation80_spill] sm:$0xff] %v7250_v43  ;;  %v8830_v23 = vand.u32 4294901760, %v7243_v27  ;;  %v375_v57 = vand.u32 4294901760, %v374_v62  ;;  %v7261_v32 = vand.u32 4294901760, %v133_v45  ;;  %v385_v54 = vsub.f32 %v7235_v16, %v7250_v43 }
  0x62   :  { %5845 = vmatprep.subr.bf16.mxu1 %v5844_v39  ;;  %v5848_v2 = vpack.c.bf16 %v1952_v61, %v1945_v33  ;;  %v1958_v21 = vsub.f32 %v7228_v53, %v8829_v29  ;;  %v8990_v62 = vand.u32 4294901760, %v6922_v55  ;;  %v8991_v61 = vand.u32 4294901760, %v6933_v48  ;;  %564 = vmatprep.subr.mxu0 %v563_v46 }
  0x63   :  { %5847 = vmatpush3.bf16.msra.mxu1 %v5844_v39  ;;  %v1965_v31 = vsub.f32 %v7243_v27, %v8830_v23  ;;  %v7277_v39 = vsub.f32 %v133_v45, %v7261_v32  ;;  %v136_v23 = vsel %vm89_vm1, %v49_v52, 0  ;;  %v386_v5 = vand.u32 4294901760, %v385_v54  ;;  %5076 = vmatprep.mubr.f32.mxu1 %v375_v57 }
  0x64   :  { %v7273_v0 = vsub.f32 %v6922_v55, %v8990_v62  ;;  %5849 = vmatprep.subr.bf16.mxu1 %v5848_v2  ;;  %v1959_v33 = vand.u32 4294901760, %v1958_v21  ;;  %v7282_v29 = vsub.f32 %v6933_v48, %v8991_v61  ;;  %v8992_v55 = vand.u32 4294901760, %v6748_v3  ;;  %376 = vmatmul.mubr.f32.gmra.mrb[24].mxu0 %v375_v57 }
  0x65   :  { %v1966_v43 = vand.u32 4294901760, %v1965_v31  ;;  %v7290_v45 = vand.u32 4294901760, %v7277_v39  ;;  %v7293_v48 = vand.u32 4294901760, %v136_v23  ;;  %v7297_v52 = vsub.f32 %v6703_v30, %v6728_v50  ;;  %381 = vmatprep.mubr.f32.mxu0 %v8943_v60  ;;  %5077 = vmatmul.mubr.f32.gmra.mrb[12].mxu1 %v386_v5 }
  0x66   :  { %v568_v62 = vsub.f32 %v6748_v3, %v8992_v55  ;;  %v1971_v9 = vand.u32 4294901760, %v7273_v0  ;;  %v1978_v21 = vand.u32 4294901760, %v7282_v29  ;;  %v5716_v57 = vpack.c.bf16 %v6633_v18, %v6631_v17 }
  0x67   :  { %8993 = vst [vmem:[#allocation81_spill] sm:$0xff] %v7290_v45  ;;  %5851 = vmatpush3.bf16.msra.mxu1 %v5848_v2  ;;  %v5852_v46 = vpack.c.bf16 %v1966_v43, %v1959_v33  ;;  %v396_v61 = vsub.f32 %v7277_v39, %v7290_v45  ;;  %v7307_v63 = vsub.f32 %v136_v23, %v7293_v48  ;;  %v7310_v30 = vand.u32 4294901760, %v7297_v52 }
  0x68   :  { %v569_v54 = vand.u32 4294901760, %v568_v62  ;;  %v1972_v31 = vsub.f32 %v7273_v0, %v1971_v9  ;;  %v1979_v55 = vsub.f32 %v7282_v29, %v1978_v21  ;;  %v5718_v2 = vpack.c.bf16 %v6639_v24, %v6635_v19  ;;  %387 = vmatmul.mubr.f32.gmra.mrb[26].mxu0 %v386_v5 }
  0x69   :  { %5853 = vmatprep.subr.bf16.mxu1 %v5852_v46  ;;  %v5720_v33 = vpack.c.bf16 %v6646_v28, %v6643_v26  ;;  %v397_v62 = vand.u32 4294901760, %v396_v61  ;;  %v7317_v18 = vand.u32 4294901760, %v7307_v63  ;;  %v1986_v23 = vsub.f32 %v7297_v52, %v7310_v30  ;;  %392 = vmatprep.mubr.f32.mxu0 %v8943_v60 }
  0x6a   :  { %570 = vmatpush1.msra.mxu0 %v569_v54  ;;  %v1973_v43 = vand.u32 4294901760, %v1972_v31  ;;  %v1980_v45 = vand.u32 4294901760, %v1979_v55  ;;  %v5722_v54 = vpack.c.bf16 %v6654_v41, %v6652_v40  ;;  %v5724_v61 = vpack.c.bf16 %v6660_v47, %v6656_v42  ;;  %v9000_v42 = vld [vmem:[#allocation39_spill] sm:$0xff] }
  0x6b   :  { %5717 = vmatprep.subr.bf16.mxu0 %v5716_v57  ;;  %5855 = vmatpush3.bf16.msra.mxu1 %v5852_v46  ;;  %v407_v28 = vsub.f32 %v7307_v63, %v7317_v18  ;;  %v1987_v5 = vand.u32 4294901760, %v1986_v23  ;;  %v5726_v55 = vpack.c.bf16 %v6666_v51, %v6664_v49  ;;  %v8994_v46 = vand.u32 4294901760, %v7062_v10 }
  0x6c   :  { %v5856_v31 = vpack.c.bf16 %v1980_v45, %v1973_v43  ;;  %5079 = vmatprep.mubr.f32.mxu1 %v397_v62  ;;  %398 = vmatmul.mubr.f32.gmra.mrb[28].mxu0 %v397_v62  ;;  %v5860_v45 = vpack.c.bf16 %v7074_v11, %v7062_v10  ;;  %v8995_v43 = vand.u32 4294901760, %v7074_v11  ;;  %v8996_v47 = vand.u32 4294901760, %v7099_v20 }
  0x6d   :  { %v408_v57 = vand.u32 4294901760, %v407_v28  ;;  %403 = vmatprep.mubr.f32.mxu0 %v8943_v60  ;;  %v8997_v62 = vand.u32 4294901760, %v7107_v58  ;;  %v8998_v28 = vand.u32 4294901760, %v7161_v37  ;;  %v9001_v10 = vand.u32 4294901760, %v7183_v25 }
  0x6e   :  { %5857 = vmatprep.subr.bf16.mxu1 %v5856_v31  ;;  %v7337_v23 = vpack.c.bf16 %v8995_v43, %v8994_v46  ;;  %v9002_v11 = vand.u32 4294901760, %v7192_v13  ;;  %v9003_v43 = vand.u32 4294901760, %v7228_v53  ;;  %v9004_v41 = vand.u32 4294901760, %v7243_v27 }
  0x6f   :  { %5859 = vmatpush3.bf16.msra.mxu1 %v5856_v31  ;;  %v7343_v51 = vpack.c.bf16 %v8997_v62, %v8996_v47  ;;  %v8999_v31 = vand.u32 4294901760, %v7170_v56  ;;  %v7364_v62 = vpack.c.bf16 %v1978_v21, %v1971_v9  ;;  %v9007_v9 = vld [vmem:[#allocation51_spill] sm:$0xff]  ;;  %v9009_v21 = vld [vmem:[#allocation57_spill] sm:$0xff] }
  0x70   :  { %5080 = vmatmul.mubr.f32.gmra.mrb[14].mxu1 %v408_v57  ;;  %5106 = vmatprep.subr.mxu1 %v1987_v5  ;;  %v7356_v46 = vpack.c.bf16 %v9002_v11, %v9001_v10  ;;  %v7362_v47 = vpack.c.bf16 %v9004_v41, %v9003_v43  ;;  %v9006_v10 = vld [vmem:[#allocation46_spill] sm:$0xff]  ;;  %v5868_v41 = vpack.c.bf16 %v7170_v56, %v7161_v37  ;;  %v9010_v37 = vld [vmem:[#allocation19_spill] sm:$0xff]  ;;  %v9011_v56 = vld [vmem:[#allocation21_spill] sm:$0xff] }
  0x71   :  { %v7349_v49 = vpack.c.bf16 %v8999_v31, %v8998_v28  ;;  %5108 = vmatprep.mubr.f32.mxu1 %v9000_v42  ;;  %409 = vmatmul.mubr.f32.gmra.mrb[30].mxu0 %v408_v57  ;;  %v5864_v28 = vpack.c.bf16 %v7107_v58, %v7099_v20  ;;  %v9005_v31 = vld [vmem:[#allocation42_spill] sm:$0xff]  ;;  %v9008_v20 = vld [vmem:[#allocation53_spill] sm:$0xff]  ;;  %v5872_v58 = vpack.c.bf16 %v7192_v13, %v7183_v25  ;;  %v9014_v13 = vld [vmem:[#allocation24_spill] sm:$0xff] }
  0x72   :  { %609 = vmatprep.mubr.f32.mxu0 %v8943_v60  ;;  %v9013_v25 = vld [vmem:[#allocation22_spill] sm:$0xff]  ;;  %v9018_v11 = vld [vmem:[#allocation45_spill] sm:$0xff] }
  0x73   :  { %5107 = vmatpush3.msra.mxu1 %v1987_v5  ;;  %v9012_v5 = vld [vmem:[#allocation63_spill] sm:$0xff]  ;;  %v9015_v57 = vld [vmem:[#allocation66_spill] sm:$0xff] }
  0x74   :  { %5109 = vmatmul.mubr.f32.vlgmr.msra.gmra.mrb[0].mxu1 %v9005_v31  ;;  %5861 = vmatprep.subr.bf16.mxu1 %v5860_v45  ;;  %v9019_v43 = vld [vmem:[#allocation6_spill] sm:$0xff] }
  0x75   :  { %5111 = vmatprep.mubr.f32.mxu1 %v9006_v10  ;;  %5863 = vmatpush3.bf16.msra.mxu1 %v5860_v45  ;;  %v9017_v45 = vld [vmem:[#allocation75_spill] sm:$0xff] }
  0x76   :  { %611 = vmatmul.mubr.f32.vlgmr.msra.gmra.mrb[0].mxu0 %v9000_v42  ;;  %5865 = vmatprep.subr.bf16.mxu1 %v5864_v28 }
  0x77   :  { %5719 = vmatpush1.bf16.msra.mxu0 %v5718_v2  ;;  %616 = vmatprep.mubr.f32.mxu0 %v8943_v60  ;;  %v5728_v2 = vpack.c.bf16 %v9011_v56, %v9010_v37 }
  0x78   :  { %5112 = vmatmul.mubr.f32.gmra.mrb[2].mxu1 %v9007_v9  ;;  %5721 = vmatprep.subr.bf16.mxu0 %v5720_v33  ;;  %v5876_v33 = vpack.c.bf16 %v7243_v27, %v7228_v53  ;;  %v5880_v53 = vpack.c.bf16 %v7282_v29, %v7273_v0  ;;  %v5734_v27 = vpack.c.bf16 %v6695_v15, %v6693_v14  ;;  %v9016_v29 = vld [vmem:[#allocation35_spill] sm:$0xff]  ;;  %v9039_v15 = vld [vmem:[#allocation8_spill] sm:$0xff] }
  0x79   :  { %5114 = vmatprep.mubr.f32.mxu1 %v9008_v20  ;;  %5867 = vmatpush3.bf16.msra.mxu1 %v5864_v28  ;;  %v5738_v0 = vpack.c.bf16 %v6722_v44, %v9016_v29  ;;  %v9020_v28 = vld [vmem:[#allocation41_spill] sm:$0xff]  ;;  %v9036_v29 = vld [vmem:[#allocation43_spill] sm:$0xff] }
  0x7a   :  { %618 = vmatmul.mubr.f32.gmra.mrb[2].mxu0 %v9005_v31  ;;  %5869 = vmatprep.subr.bf16.mxu1 %v5868_v41  ;;  %v9035_v44 = vld [vmem:[#allocation65_spill] sm:$0xff]  ;;  %v9040_v14 = vld [vmem:[#allocation55_spill] sm:$0xff] }
  0x7b   :  { %623 = vmatprep.mubr.f32.mxu0 %v8943_v60  ;;  %5723 = vmatpush1.bf16.msra.mxu0 %v5722_v54  ;;  %v5730_v54 = vpack.c.bf16 %v9014_v13, %v9013_v25  ;;  %v9046_v13 = vld [vmem:[#allocation67_spill] sm:$0xff] }
  0x7c   :  { %5115 = vmatmul.mubr.f32.gmra.mrb[4].mxu1 %v9009_v21  ;;  %5725 = vmatprep.subr.bf16.mxu0 %v5724_v61  ;;  %v5732_v61 = vpack.c.bf16 %v6689_v12, %v6684_v8  ;;  %v9041_v12 = vld [vmem:[#allocation9_spill] sm:$0xff]  ;;  %v9042_v8 = vld [vmem:[#allocation58_spill] sm:$0xff] }
  0x7d   :  { %5117 = vmatprep.mubr.f32.mxu1 %v9012_v5  ;;  %5871 = vmatpush3.bf16.msra.mxu1 %v5868_v41  ;;  %v9021_v41 = vld [vmem:[#allocation44_spill] sm:$0xff] }
  0x7e   :  { %625 = vmatmul.mubr.f32.gmra.mrb[4].mxu0 %v9006_v10  ;;  %5873 = vmatprep.subr.bf16.mxu1 %v5872_v58 }
  0x7f   :  { %630 = vmatprep.mubr.f32.mxu0 %v8943_v60  ;;  %5727 = vmatpush1.bf16.msra.mxu0 %v5726_v55  ;;  %v5736_v55 = vpack.c.bf16 %v6711_v35, %v6709_v34  ;;  %v9037_v35 = vld [vmem:[#allocation47_spill] sm:$0xff]  ;;  %v9038_v34 = vld [vmem:[#allocation49_spill] sm:$0xff] }
  0x80   :  { %5118 = vmatmul.mubr.f32.gmra.mrb[6].mxu1 %v9015_v57  ;;  %5729 = vmatprep.subr.bf16.mxu0 %v5728_v2  ;;  %v9024_v2 = vld [vmem:[#allocation52_spill] sm:$0xff] }
  0x81   :  { %5120 = vmatprep.mubr.f32.mxu1 %v7016_v7  ;;  %5875 = vmatpush3.bf16.msra.mxu1 %v5872_v58  ;;  %v9023_v58 = vld [vmem:[#allocation50_spill] sm:$0xff] }
  0x82   :  { %632 = vmatmul.mubr.f32.gmra.mrb[6].mxu0 %v9007_v9  ;;  %5877 = vmatprep.subr.bf16.mxu1 %v5876_v33 }
  0x83   :  { %637 = vmatprep.mubr.f32.mxu0 %v8943_v60  ;;  %5731 = vmatpush1.bf16.msra.mxu0 %v5730_v54  ;;  %v9026_v54 = vld [vmem:[#allocation54_spill] sm:$0xff] }
  0x84   :  { %5121 = vmatmul.mubr.f32.gmra.mrb[8].mxu1 %v7018_v59  ;;  %5733 = vmatprep.subr.bf16.mxu0 %v5732_v61  ;;  %v9027_v61 = vld [vmem:[#allocation60_spill] sm:$0xff] }
  0x85   :  { %5123 = vmatprep.mubr.f32.mxu1 %v7094_v6  ;;  %5879 = vmatpush3.bf16.msra.mxu1 %v5876_v33  ;;  %v9025_v33 = vld [vmem:[#allocation56_spill] sm:$0xff] }
  0x86   :  { %639 = vmatmul.mubr.f32.gmra.mrb[8].mxu0 %v9008_v20  ;;  %5881 = vmatprep.subr.bf16.mxu1 %v5880_v53 }
  0x87   :  { %644 = vmatprep.mubr.f32.mxu0 %v8943_v60  ;;  %5735 = vmatpush1.bf16.msra.mxu0 %v5734_v27  ;;  %v9029_v27 = vld [vmem:[#allocation59_spill] sm:$0xff] }
  0x88   :  { %5124 = vmatmul.mubr.f32.gmra.mrb[10].mxu1 %v9017_v45  ;;  %5737 = vmatprep.subr.bf16.mxu0 %v5736_v55  ;;  %v9030_v55 = vld [vmem:[#allocation68_spill] sm:$0xff] }
  0x89   :  { %5126 = vmatprep.mubr.f32.mxu1 %v7187_v1  ;;  %5883 = vmatpush3.bf16.msra.mxu1 %v5880_v53  ;;  %v9028_v53 = vld [vmem:[#allocation64_spill] sm:$0xff] }
  0x8a   :  { %646 = vmatmul.mubr.f32.gmra.mrb[10].mxu0 %v9009_v21  ;;  %5156 = vmatprep.subr.mxu1 %v7297_v52 }
  0x8b   :  { %651 = vmatprep.mubr.f32.mxu0 %v8943_v60  ;;  %5739 = vmatpush1.bf16.msra.mxu0 %v5738_v0  ;;  %v9031_v0 = vld [vmem:[#allocation70_spill] sm:$0xff] }
  0x8c   :  { %5127 = vmatmul.mubr.f32.gmra.mrb[12].mxu1 %v7216_v4  ;;  %796 = vmatprep.subr.mxu0 %v7202_v38  ;;  %v9034_v38 = vld [vmem:[#allocation74_spill] sm:$0xff] }
  0x8d   :  { %5129 = vmatprep.mubr.f32.mxu1 %v7261_v32  ;;  %5157 = vmatpush3.msra.mxu1 %v7297_v52  ;;  %v9022_v52 = vld [vmem:[#allocation48_spill] sm:$0xff] }
  0x8e   :  { %653 = vmatmul.mubr.f32.gmra.mrb[12].mxu0 %v9012_v5  ;;  %5885 = vmatprep.subr.bf16.mxu1 %v9018_v11 }
  0x8f   :  { %658 = vmatprep.mubr.f32.mxu0 %v8943_v60  ;;  %799 = vmatpush1.msra.mxu0 %v6748_v3  ;;  %v9033_v3 = vld [vmem:[#allocation71_spill] sm:$0xff] }
  0x90   :  { %5130 = vmatmul.mubr.f32.gmra.mrb[14].mxu1 %v7293_v48  ;;  %5741 = vmatprep.subr.bf16.mxu0 %v9019_v43  ;;  %v9032_v43 = vld [vmem:[#allocation62_spill] sm:$0xff] }
  0x91   :  { %5158 = vmatprep.mubr.f32.mxu1 %v9020_v28 }
  0x92   :  { %660 = vmatmul.mubr.f32.gmra.mrb[14].mxu0 %v9015_v57 }
  0x93   :  { %665 = vmatprep.mubr.f32.mxu0 %v8943_v60 }
  0x94   :  { %5159 = vmatmul.mubr.f32.vlgmr.msra.gmra.mrb[0].mxu1 %v9021_v41 }
  0x95   :  { %5161 = vmatprep.mubr.f32.mxu1 %v9022_v52  ;;  %5887 = vmatpush3.bf16.msra.mxu1 %v9018_v11 }
  0x96   :  { %667 = vmatmul.mubr.f32.gmra.mrb[16].mxu0 %v7016_v7  ;;  %5889 = vmatprep.subr.bf16.mxu1 %v9023_v58 }
  0x97   :  { %672 = vmatprep.mubr.f32.mxu0 %v8943_v60 }
  0x98   :  { %5162 = vmatmul.mubr.f32.gmra.mrb[2].mxu1 %v9024_v2 }
  0x99   :  { %5164 = vmatprep.mubr.f32.mxu1 %v9025_v33  ;;  %5891 = vmatpush3.bf16.msra.mxu1 %v9023_v58 }
  0x9a   :  { %674 = vmatmul.mubr.f32.gmra.mrb[18].mxu0 %v7018_v59  ;;  %5893 = vmatprep.subr.bf16.mxu1 %v9026_v54 }
  0x9b   :  { %679 = vmatprep.mubr.f32.mxu0 %v8943_v60 }
  0x9c   :  { %5165 = vmatmul.mubr.f32.gmra.mrb[4].mxu1 %v9027_v61 }
  0x9d   :  { %5167 = vmatprep.mubr.f32.mxu1 %v9028_v53  ;;  %5895 = vmatpush3.bf16.msra.mxu1 %v9026_v54 }
  0x9e   :  { %681 = vmatmul.mubr.f32.gmra.mrb[20].mxu0 %v7094_v6  ;;  %5897 = vmatprep.subr.bf16.mxu1 %v9029_v27 }
  0x9f   :  { %686 = vmatprep.mubr.f32.mxu0 %v8943_v60 }
  0xa0   :  { %5168 = vmatmul.mubr.f32.gmra.mrb[6].mxu1 %v9030_v55 }
  0xa1   :  { %5170 = vmatprep.mubr.f32.mxu1 %v9031_v0  ;;  %5899 = vmatpush3.bf16.msra.mxu1 %v9029_v27 }
  0xa2   :  { %688 = vmatmul.mubr.f32.gmra.mrb[22].mxu0 %v9017_v45  ;;  %5901 = vmatprep.subr.bf16.mxu1 %v9032_v43 }
  0xa3   :  { %693 = vmatprep.mubr.f32.mxu0 %v8943_v60 }
  0xa4   :  { %5171 = vmatmul.mubr.f32.gmra.mrb[8].mxu1 %v9033_v3 }
  0xa5   :  { %5173 = vmatprep.mubr.f32.mxu1 %v9034_v38  ;;  %5903 = vmatpush3.bf16.msra.mxu1 %v9032_v43 }
  0xa6   :  { %695 = vmatmul.mubr.f32.gmra.mrb[24].mxu0 %v7187_v1  ;;  %5905 = vmatprep.subr.bf16.mxu1 %v9035_v44 }
  0xa7   :  { %700 = vmatprep.mubr.f32.mxu0 %v8943_v60 }
  0xa8   :  { %5174 = vmatmul.mubr.f32.gmra.mrb[10].mxu1 %v7129_v36 }
  0xa9   :  { %5176 = vmatprep.mubr.f32.mxu1 %v7209_v22  ;;  %5907 = vmatpush3.bf16.msra.mxu1 %v9035_v44 }
  0xaa   :  { %702 = vmatmul.mubr.f32.gmra.mrb[26].mxu0 %v7216_v4  ;;  %5206 = vmatprep.subr.mxu1 %v6728_v50 }
  0xab   :  { %707 = vmatprep.mubr.f32.mxu0 %v8943_v60 }
  0xac   :  { %5177 = vmatmul.mubr.f32.gmra.mrb[12].mxu1 %v7235_v16 }
  0xad   :  { %5179 = vmatprep.mubr.f32.mxu1 %v7277_v39  ;;  %5207 = vmatpush3.msra.mxu1 %v6728_v50 }
  0xae   :  { %709 = vmatmul.mubr.f32.gmra.mrb[28].mxu0 %v7261_v32  ;;  %5909 = vmatprep.subr.bf16.mxu1 %v7337_v23 }
  0xaf   :  { %714 = vmatprep.mubr.f32.mxu0 %v8943_v60 }
  0xb0   :  { %5180 = vmatmul.mubr.f32.gmra.mrb[14].mxu1 %v7307_v63 }
  0xb1   :  { %5208 = vmatprep.mubr.f32.mxu1 %v9036_v29 }
  0xb2   :  { %716 = vmatmul.mubr.f32.gmra.mrb[30].mxu0 %v7293_v48 }
  0xb3   :  { %838 = vmatprep.mubr.f32.mxu0 %v8943_v60 }
  0xb4   :  { %5209 = vmatmul.mubr.f32.vlgmr.msra.gmra.mrb[0].mxu1 %v9037_v35 }
  0xb5   :  { %5211 = vmatprep.mubr.f32.mxu1 %v9038_v34  ;;  %5911 = vmatpush3.bf16.msra.mxu1 %v7337_v23  ;;  %v9043_v23 = vld [vmem:[#allocation11_spill] sm:$0xff] }
  0xb6   :  { %841 = vmatmul.mubr.f32.vlgmr.msra.gmra.mrb[0].mxu0 %v9020_v28  ;;  %5913 = vmatprep.subr.bf16.mxu1 %v7343_v51  ;;  %v9044_v28 = vld [vmem:[#allocation61_spill] sm:$0xff] }
  0xb7   :  { %5743 = vmatpush1.bf16.msra.mxu0 %v9039_v15  ;;  %846 = vmatprep.mubr.f32.mxu0 %v8943_v60  ;;  %v9045_v15 = vld [vmem:[#allocation14_spill] sm:$0xff] }
  0xb8   :  { %5212 = vmatmul.mubr.f32.gmra.mrb[2].mxu1 %v9040_v14  ;;  %5745 = vmatprep.subr.bf16.mxu0 %v9041_v12  ;;  %v9049_v12 = vld [vmem:[#allocation20_spill] sm:$0xff] }
  0xb9   :  { %5214 = vmatprep.mubr.f32.mxu1 %v9042_v8  ;;  %5915 = vmatpush3.bf16.msra.mxu1 %v7343_v51  ;;  %v9047_v51 = vld [vmem:[#allocation16_spill] sm:$0xff] }
  0xba   :  { %849 = vmatmul.mubr.f32.gmra.mrb[2].mxu0 %v9021_v41  ;;  %5917 = vmatprep.subr.bf16.mxu1 %v7349_v49  ;;  %v9048_v41 = vld [vmem:[#allocation69_spill] sm:$0xff] }
  0xbb   :  { %854 = vmatprep.mubr.f32.mxu0 %v8943_v60  ;;  %5747 = vmatpush1.bf16.msra.mxu0 %v9043_v23  ;;  %v9050_v23 = vld [vmem:[#allocation72_spill] sm:$0xff] }
  0xbc   :  { %5215 = vmatmul.mubr.f32.gmra.mrb[4].mxu1 %v9044_v28  ;;  %5749 = vmatprep.subr.bf16.mxu0 %v9045_v15  ;;  %v9053_v15 = vld [vmem:[#allocation25_spill] sm:$0xff] }
  0xbd   :  { %5217 = vmatprep.mubr.f32.mxu1 %v9046_v13  ;;  %5919 = vmatpush3.bf16.msra.mxu1 %v7349_v49  ;;  %v9051_v49 = vld [vmem:[#allocation23_spill] sm:$0xff] }
  0xbe   :  { %857 = vmatmul.mubr.f32.gmra.mrb[4].mxu0 %v9022_v52  ;;  %5921 = vmatprep.subr.bf16.mxu1 %v7356_v46  ;;  %v9052_v52 = vld [vmem:[#allocation73_spill] sm:$0xff] }
  0xbf   :  { %862 = vmatprep.mubr.f32.mxu0 %v8943_v60  ;;  %5751 = vmatpush1.bf16.msra.mxu0 %v9047_v51  ;;  %v9054_v51 = vld [vmem:[#allocation76_spill] sm:$0xff] }
  0xc0   :  { %5218 = vmatmul.mubr.f32.gmra.mrb[6].mxu1 %v9048_v41  ;;  %5753 = vmatprep.subr.bf16.mxu0 %v9049_v12  ;;  %v9057_v12 = vld [vmem:[#allocation31_spill] sm:$0xff] }
  0xc1   :  { %5220 = vmatprep.mubr.f32.mxu1 %v9050_v23  ;;  %5923 = vmatpush3.bf16.msra.mxu1 %v7356_v46  ;;  %v9055_v46 = vld [vmem:[#allocation28_spill] sm:$0xff] }
  0xc2   :  { %865 = vmatmul.mubr.f32.gmra.mrb[6].mxu0 %v9024_v2  ;;  %5925 = vmatprep.subr.bf16.mxu1 %v7362_v47  ;;  %v9056_v2 = vld [vmem:[#allocation77_spill] sm:$0xff] }
  0xc3   :  { %870 = vmatprep.mubr.f32.mxu0 %v8943_v60  ;;  %5755 = vmatpush1.bf16.msra.mxu0 %v9051_v49  ;;  %v9058_v49 = vld [vmem:[#allocation79_spill] sm:$0xff] }
  0xc4   :  { %5221 = vmatmul.mubr.f32.gmra.mrb[8].mxu1 %v9052_v52  ;;  %5757 = vmatprep.subr.bf16.mxu0 %v9053_v15  ;;  %v9061_v15 = vld [vmem:[#allocation37_spill] sm:$0xff] }
  0xc5   :  { %5223 = vmatprep.mubr.f32.mxu1 %v9054_v51  ;;  %5927 = vmatpush3.bf16.msra.mxu1 %v7362_v47  ;;  %v9059_v47 = vld [vmem:[#allocation34_spill] sm:$0xff] }
  0xc6   :  { %873 = vmatmul.mubr.f32.gmra.mrb[8].mxu0 %v9025_v33  ;;  %5929 = vmatprep.subr.bf16.mxu1 %v7364_v62  ;;  %v9060_v33 = vld [vmem:[#allocation80_spill] sm:$0xff] }
  0xc7   :  { %878 = vmatprep.mubr.f32.mxu0 %v8943_v60  ;;  %5759 = vmatpush1.bf16.msra.mxu0 %v9055_v46  ;;  %v9062_v46 = vand.u32 4294901760, %v6631_v17  ;;  %v9067_v17 = vand.u32 4294901760, %v6635_v19  ;;  %v9073_v19 = vld [vmem:[#allocation12_spill] sm:$0xff] }
  0xc8   :  { %5224 = vmatmul.mubr.f32.gmra.mrb[10].mxu1 %v9056_v2  ;;  %5761 = vmatprep.subr.bf16.mxu0 %v9057_v12  ;;  %v9063_v2 = vld [vmem:[#allocation7_spill] sm:$0xff] }
  0xc9   :  { %5226 = vmatprep.mubr.f32.mxu1 %v9058_v49  ;;  %5931 = vmatpush3.bf16.msra.mxu1 %v7364_v62  ;;  %v9064_v12 = vand.u32 4294901760, %v9063_v2  ;;  %v9065_v49 = vld [vmem:[#allocation81_spill] sm:$0xff]  ;;  %v9066_v62 = vld [vmem:[#allocation38_spill] sm:$0xff]  ;;  %v9090_v2 = vld [vmem:[#allocation27_spill] sm:$0xff] }
  0xca   :  { %881 = vmatmul.mubr.f32.gmra.mrb[10].mxu0 %v9027_v61  ;;  %5256 = vmatprep.subr.mxu1 %v7310_v30  ;;  %v9083_v61 = vand.u32 4294901760, %v9010_v37 }
  0xcb   :  { %886 = vmatprep.mubr.f32.mxu0 %v8943_v60  ;;  %5763 = vmatpush1.bf16.msra.mxu0 %v9059_v47  ;;  %v5764_v51 = vpack.c.bf16 %v9064_v12, %v9062_v46  ;;  %v9068_v12 = vand.u32 4294901760, %v6639_v24  ;;  %v9088_v46 = vld [vmem:[#allocation26_spill] sm:$0xff] }
  0xcc   :  { %5227 = vmatmul.mubr.f32.gmra.mrb[12].mxu1 %v9060_v33  ;;  %1016 = vmatprep.subr.mxu0 %v9061_v15  ;;  %v9089_v37 = vand.u32 4294901760, %v9088_v46 }
  0xcd   :  { %5229 = vmatprep.mubr.f32.mxu1 %v9065_v49  ;;  %5257 = vmatpush3.msra.mxu1 %v7310_v30 }
  0xce   :  { %889 = vmatmul.mubr.f32.gmra.mrb[12].mxu0 %v9028_v53  ;;  %5933 = vmatprep.subr.bf16.mxu1 %v9018_v11  ;;  %v9084_v53 = vand.u32 4294901760, %v9011_v56  ;;  %v9091_v56 = vand.u32 4294901760, %v9090_v2 }
  0xcf   :  { %894 = vmatprep.mubr.f32.mxu0 %v8943_v60  ;;  %1018 = vmatpush1.msra.mxu0 %v9066_v62 }
  0xd0   :  { %5230 = vmatmul.mubr.f32.gmra.mrb[14].mxu1 %v7317_v18  ;;  %5765 = vmatprep.subr.bf16.mxu0 %v5764_v51 }
  0xd1   :  { %5258 = vmatprep.mubr.f32.mxu1 %v9000_v42 }
  0xd2   :  { %897 = vmatmul.mubr.f32.gmra.mrb[14].mxu0 %v9030_v55  ;;  %v9086_v55 = vld [vmem:[#allocation24_spill] sm:$0xff] }
  0xd3   :  { %902 = vmatprep.mubr.f32.mxu0 %v8943_v60 }
  0xd4   :  { %5259 = vmatmul.mubr.f32.vlgmr.msra.gmra.mrb[0].mxu1 %v9005_v31 }
  0xd5   :  { %5261 = vmatprep.mubr.f32.mxu1 %v9006_v10  ;;  %5935 = vmatpush3.bf16.msra.mxu1 %v9018_v11 }
  0xd6   :  { %905 = vmatmul.mubr.f32.gmra.mrb[16].mxu0 %v9031_v0  ;;  %5937 = vmatprep.subr.bf16.mxu1 %v9023_v58  ;;  %v9087_v0 = vand.u32 4294901760, %v9086_v55 }
  0xd7   :  { %910 = vmatprep.mubr.f32.mxu0 %v8943_v60 }
  0xd8   :  { %5262 = vmatmul.mubr.f32.gmra.mrb[2].mxu1 %v9007_v9 }
  0xd9   :  { %5264 = vmatprep.mubr.f32.mxu1 %v9008_v20  ;;  %5939 = vmatpush3.bf16.msra.mxu1 %v9023_v58 }
  0xda   :  { %913 = vmatmul.mubr.f32.gmra.mrb[18].mxu0 %v9033_v3  ;;  %5941 = vmatprep.subr.bf16.mxu1 %v9026_v54  ;;  %v9070_v3 = vld [vmem:[#allocation10_spill] sm:$0xff] }
  0xdb   :  { %918 = vmatprep.mubr.f32.mxu0 %v8943_v60 }
  0xdc   :  { %5265 = vmatmul.mubr.f32.gmra.mrb[4].mxu1 %v9009_v21 }
  0xdd   :  { %5267 = vmatprep.mubr.f32.mxu1 %v9012_v5  ;;  %5943 = vmatpush3.bf16.msra.mxu1 %v9026_v54 }
  0xde   :  { %921 = vmatmul.mubr.f32.gmra.mrb[20].mxu0 %v9034_v38  ;;  %5945 = vmatprep.subr.bf16.mxu1 %v9029_v27  ;;  %v9072_v38 = vand.u32 4294901760, %v6652_v40 }
  0xdf   :  { %926 = vmatprep.mubr.f32.mxu0 %v8943_v60 }
  0xe0   :  { %5268 = vmatmul.mubr.f32.gmra.mrb[6].mxu1 %v9015_v57 }
  0xe1   :  { %5270 = vmatprep.mubr.f32.mxu1 %v7016_v7  ;;  %5947 = vmatpush3.bf16.msra.mxu1 %v9029_v27  ;;  %v5776_v27 = vpack.c.bf16 %v9084_v53, %v9083_v61  ;;  %v9121_v61 = vld [vmem:[#allocation31_spill] sm:$0xff] }
  0xe2   :  { %929 = vmatmul.mubr.f32.gmra.mrb[22].mxu0 %v7129_v36  ;;  %5949 = vmatprep.subr.bf16.mxu1 %v9032_v43 }
  0xe3   :  { %934 = vmatprep.mubr.f32.mxu0 %v8943_v60 }
  0xe4   :  { %5271 = vmatmul.mubr.f32.gmra.mrb[8].mxu1 %v7018_v59 }
  0xe5   :  { %5273 = vmatprep.mubr.f32.mxu1 %v7094_v6  ;;  %5951 = vmatpush3.bf16.msra.mxu1 %v9032_v43  ;;  %v9081_v43 = vld [vmem:[#allocation18_spill] sm:$0xff] }
  0xe6   :  { %937 = vmatmul.mubr.f32.gmra.mrb[24].mxu0 %v7209_v22  ;;  %5953 = vmatprep.subr.bf16.mxu1 %v9035_v44  ;;  %v9074_v22 = vand.u32 4294901760, %v9073_v19  ;;  %v9082_v58 = vand.u32 4294901760, %v9081_v43  ;;  %v9118_v43 = vld [vmem:[#allocation23_spill] sm:$0xff] }
  0xe7   :  { %942 = vmatprep.mubr.f32.mxu0 %v8943_v60 }
  0xe8   :  { %5274 = vmatmul.mubr.f32.gmra.mrb[10].mxu1 %v9017_v45  ;;  %v5770_v24 = vpack.c.bf16 %v9074_v22, %v9072_v38 }
  0xe9   :  { %5276 = vmatprep.mubr.f32.mxu1 %v7187_v1  ;;  %5955 = vmatpush3.bf16.msra.mxu1 %v9035_v44  ;;  %v5766_v44 = vpack.c.bf16 %v9068_v12, %v9067_v17  ;;  %v5780_v17 = vpack.c.bf16 %v9091_v56, %v9089_v37  ;;  %v9094_v12 = vld [vmem:[#allocation30_spill] sm:$0xff] }
  0xea   :  { %945 = vmatmul.mubr.f32.gmra.mrb[26].mxu0 %v7235_v16  ;;  %5306 = vmatprep.subr.mxu1 %v6728_v50  ;;  %v9071_v16 = vand.u32 4294901760, %v9070_v3  ;;  %v9096_v3 = vld [vmem:[#allocation32_spill] sm:$0xff] }
  0xeb   :  { %950 = vmatprep.mubr.f32.mxu0 %v8943_v60 }
  0xec   :  { %5277 = vmatmul.mubr.f32.gmra.mrb[12].mxu1 %v7216_v4 }
  0xed   :  { %5279 = vmatprep.mubr.f32.mxu1 %v7261_v32  ;;  %5307 = vmatpush3.msra.mxu1 %v6728_v50  ;;  %v9069_v50 = vand.u32 4294901760, %v6643_v26 }
  0xee   :  { %953 = vmatmul.mubr.f32.gmra.mrb[28].mxu0 %v7277_v39  ;;  %v9077_v39 = vld [vmem:[#allocation15_spill] sm:$0xff] }
  0xef   :  { %958 = vmatprep.mubr.f32.mxu0 %v8943_v60  ;;  %v5768_v36 = vpack.c.bf16 %v9071_v16, %v9069_v50  ;;  %v9078_v30 = vand.u32 4294901760, %v9077_v39  ;;  %v9097_v16 = vand.u32 4294901760, %v9096_v3 }
  0xf0   :  { %5280 = vmatmul.mubr.f32.gmra.mrb[14].mxu1 %v7293_v48 }
  0xf1   :  { %5308 = vmatprep.mubr.f32.mxu1 %v9000_v42 }
  0xf2   :  { %961 = vmatmul.mubr.f32.gmra.mrb[30].mxu0 %v7307_v63  ;;  %v9075_v63 = vld [vmem:[#allocation13_spill] sm:$0xff] }
  0xf3   :  { %1057 = vmatprep.mubr.f32.mxu0 %v8943_v60  ;;  %v9076_v26 = vand.u32 4294901760, %v9075_v63 }
  0xf4   :  { %5309 = vmatmul.mubr.f32.vlgmr.msra.gmra.mrb[0].mxu1 %v9005_v31 }
  0xf5   :  { %5311 = vmatprep.mubr.f32.mxu1 %v9006_v10  ;;  %v5772_v11 = vpack.c.bf16 %v9078_v30, %v9076_v26  ;;  %v9106_v30 = vld [vmem:[#allocation40_spill] sm:$0xff] }
  0xf6   :  { %1061 = vmatmul.mubr.f32.vlgmr.msra.gmra.mrb[0].mxu0 %v9036_v29  ;;  %v9079_v29 = vld [vmem:[#allocation17_spill] sm:$0xff] }
  0xf7   :  { %5767 = vmatpush1.bf16.msra.mxu0 %v5766_v44  ;;  %1066 = vmatprep.mubr.f32.mxu0 %v8943_v60  ;;  %v9080_v40 = vand.u32 4294901760, %v9079_v29  ;;  %v9095_v44 = vand.u32 4294901760, %v9094_v12  ;;  %v9110_v29 = vld [vmem:[#allocation77_spill] sm:$0xff] }
  0xf8   :  { %5312 = vmatmul.mubr.f32.gmra.mrb[2].mxu1 %v9007_v9  ;;  %5769 = vmatprep.subr.bf16.mxu0 %v5768_v36  ;;  %v9098_v36 = vld [vmem:[#allocation33_spill] sm:$0xff] }
  0xf9   :  { %5314 = vmatprep.mubr.f32.mxu1 %v9008_v20  ;;  %v5774_v54 = vpack.c.bf16 %v9082_v58, %v9080_v40  ;;  %v9099_v38 = vand.u32 4294901760, %v9098_v36  ;;  %v9111_v40 = vld [vmem:[#allocation79_spill] sm:$0xff]  ;;  %v9119_v58 = vld [vmem:[#allocation25_spill] sm:$0xff] }
  0xfa   :  { %1070 = vmatmul.mubr.f32.gmra.mrb[2].mxu0 %v9037_v35  ;;  %v9085_v35 = vand.u32 4294901760, %v9013_v25  ;;  %v7890_v36 = vld [vmem:[%s8676_s3 + $0x60] sm:$0xff] }
  0xfb   :  { %1075 = vmatprep.mubr.f32.mxu0 %v8943_v60  ;;  %5771 = vmatpush1.bf16.msra.mxu0 %v5770_v24  ;;  %v5784_v19 = vpack.c.bf16 %v9099_v38, %v9097_v16  ;;  %v9102_v24 = vld [vmem:[#allocation36_spill] sm:$0xff] }
  0xfc   :  { %5315 = vmatmul.mubr.f32.gmra.mrb[4].mxu1 %v9009_v21  ;;  %5773 = vmatprep.subr.bf16.mxu0 %v5772_v11  ;;  %v5778_v51 = vpack.c.bf16 %v9087_v0, %v9085_v35  ;;  %v9103_v63 = vand.u32 4294901760, %v9102_v24  ;;  %v9107_v11 = vand.u32 4294901760, %v9106_v30  ;;  %v7734_v35 = vld [vmem:[%s8676_s3 + $0x18] sm:$0xff]  ;;  %v7895_v38 = vld [vmem:[%s8676_s3 + $0x68] sm:$0xff] }
  0xfd   :  { %5317 = vmatprep.mubr.f32.mxu1 %v9012_v5  ;;  %v3011_v0 = vand.u32 4294901760, %v7734_v35 }
  0xfe   :  { %1079 = vmatmul.mubr.f32.gmra.mrb[4].mxu0 %v9038_v34  ;;  %v9092_v34 = vld [vmem:[#allocation29_spill] sm:$0xff] }
  0xff   :  { %1084 = vmatprep.mubr.f32.mxu0 %v8943_v60  ;;  %5775 = vmatpush1.bf16.msra.mxu0 %v5774_v54  ;;  %v9093_v25 = vand.u32 4294901760, %v9092_v34  ;;  %v9120_v54 = vld [vmem:[#allocation28_spill] sm:$0xff]  ;;  %v7866_v34 = vld [vmem:[%s8676_s3 + $0x50] sm:$0xff] }
 0x100   :  { %5318 = vmatmul.mubr.f32.gmra.mrb[6].mxu1 %v9015_v57  ;;  %5777 = vmatprep.subr.bf16.mxu0 %v5776_v27  ;;  %v3032_v12 = vand.u32 4294901760, %v7866_v34 }
 0x101   :  { %5320 = vmatprep.mubr.f32.mxu1 %v7016_v7  ;;  %v5782_v50 = vpack.c.bf16 %v9095_v44, %v9093_v25  ;;  %v7871_v25 = vld [vmem:[%s8676_s3 + $0x58] sm:$0xff] }
 0x102   :  { %1088 = vmatmul.mubr.f32.gmra.mrb[6].mxu0 %v9040_v14  ;;  %v9100_v14 = vld [vmem:[#allocation35_spill] sm:$0xff]  ;;  %v3035_v44 = vand.u32 4294901760, %v7871_v25 }
 0x103   :  { %1093 = vmatprep.mubr.f32.mxu0 %v8943_v60  ;;  %5779 = vmatpush1.bf16.msra.mxu0 %v5778_v51  ;;  %v9101_v22 = vand.u32 4294901760, %v9100_v14  ;;  %v3041_v14 = vand.u32 4294901760, %v7895_v38 }
 0x104   :  { %5321 = vmatmul.mubr.f32.gmra.mrb[8].mxu1 %v7018_v59  ;;  %5781 = vmatprep.subr.bf16.mxu0 %v5780_v17  ;;  %v7883_v3 = vpack.c.bf16 %v3035_v44, %v3032_v12 }
 0x105   :  { %5323 = vmatprep.mubr.f32.mxu1 %v7094_v6  ;;  %v5786_v26 = vpack.c.bf16 %v9103_v63, %v9101_v22 }
 0x106   :  { %1097 = vmatmul.mubr.f32.gmra.mrb[8].mxu0 %v9042_v8  ;;  %v9104_v8 = vld [vmem:[#allocation78_spill] sm:$0xff] }
 0x107   :  { %1102 = vmatprep.mubr.f32.mxu0 %v8943_v60  ;;  %5783 = vmatpush1.bf16.msra.mxu0 %v5782_v50  ;;  %v9105_v39 = vand.u32 4294901760, %v9104_v8  ;;  %v7919_v8 = vld [vmem:[%s8676_s3 + $0x78] sm:$0xff] }
 0x108   :  { %5324 = vmatmul.mubr.f32.gmra.mrb[10].mxu1 %v9017_v45  ;;  %5785 = vmatprep.subr.bf16.mxu0 %v5784_v19  ;;  %v3038_v19 = vand.u32 4294901760, %v7890_v36  ;;  %v3047_v30 = vand.u32 4294901760, %v7919_v8 }
 0x109   :  { %5326 = vmatprep.mubr.f32.mxu1 %v7187_v1 }
 0x10a   :  { %1106 = vmatmul.mubr.f32.gmra.mrb[10].mxu0 %v9044_v28  ;;  %v9108_v28 = vld [vmem:[#allocation6_spill] sm:$0xff]  ;;  %v7907_v24 = vpack.c.bf16 %v3041_v14, %v3038_v19 }
 0x10b   :  { %1111 = vmatprep.mubr.f32.mxu0 %v8943_v60  ;;  %5787 = vmatpush1.bf16.msra.mxu0 %v5786_v26  ;;  %v7914_v26 = vld [vmem:[%s8676_s3 + $0x70] sm:$0xff] }
 0x10c   :  { %5327 = vmatmul.mubr.f32.gmra.mrb[12].mxu1 %v7216_v4  ;;  %1301 = vmatprep.subr.mxu0 %v9105_v39  ;;  %v3044_v39 = vand.u32 4294901760, %v7914_v26 }
 0x10d   :  { %5329 = vmatprep.mubr.f32.mxu1 %v7261_v32 }
 0x10e   :  { %1115 = vmatmul.mubr.f32.gmra.mrb[12].mxu0 %v9046_v13  ;;  %v9109_v13 = vld [vmem:[#allocation76_spill] sm:$0xff] }
 0x10f   :  { %1120 = vmatprep.mubr.f32.mxu0 %v8943_v60  ;;  %1305 = vmatpush1.msra.mxu0 %v9107_v11 }
 0x110   :  { %5330 = vmatmul.mubr.f32.gmra.mrb[14].mxu1 %v7293_v48  ;;  %5789 = vmatprep.subr.bf16.mxu0 %v9108_v28  ;;  %v7931_v28 = vpack.c.bf16 %v3047_v30, %v3044_v39 }
 0x112   :  { %1124 = vmatmul.mubr.f32.gmra.mrb[14].mxu0 %v9048_v41  ;;  %v9113_v41 = vld [vmem:[#allocation9_spill] sm:$0xff] }
 0x113   :  { %1129 = vmatprep.mubr.f32.mxu0 %v8943_v60 }
 0x116   :  { %1133 = vmatmul.mubr.f32.gmra.mrb[16].mxu0 %v9050_v23  ;;  %v9112_v23 = vld [vmem:[#allocation8_spill] sm:$0xff] }
 0x117   :  { %1138 = vmatprep.mubr.f32.mxu0 %v8943_v60 }
 0x11a   :  { %1142 = vmatmul.mubr.f32.gmra.mrb[18].mxu0 %v9052_v52  ;;  %v9114_v52 = vld [vmem:[#allocation11_spill] sm:$0xff] }
 0x11b   :  { %1147 = vmatprep.mubr.f32.mxu0 %v8943_v60 }
 0x11e   :  { %1151 = vmatmul.mubr.f32.gmra.mrb[20].mxu0 %v9109_v13 }
 0x11f   :  { %1156 = vmatprep.mubr.f32.mxu0 %v8943_v60 }
 0x122   :  { %1160 = vmatmul.mubr.f32.gmra.mrb[22].mxu0 %v9110_v29 }
 0x123   :  { %1165 = vmatprep.mubr.f32.mxu0 %v8943_v60 }
 0x126   :  { %1169 = vmatmul.mubr.f32.gmra.mrb[24].mxu0 %v9111_v40 }
 0x127   :  { %1174 = vmatprep.mubr.f32.mxu0 %v8943_v60 }
 0x12a   :  { %1178 = vmatmul.mubr.f32.gmra.mrb[26].mxu0 %v9060_v33  ;;  %v9117_v33 = vld [vmem:[#allocation20_spill] sm:$0xff] }
 0x12b   :  { %1183 = vmatprep.mubr.f32.mxu0 %v8943_v60 }
 0x12e   :  { %1187 = vmatmul.mubr.f32.gmra.mrb[28].mxu0 %v9065_v49  ;;  %v9115_v49 = vld [vmem:[#allocation14_spill] sm:$0xff] }
 0x12f   :  { %1192 = vmatprep.mubr.f32.mxu0 %v8943_v60 }
 0x132   :  { %1196 = vmatmul.mubr.f32.gmra.mrb[30].mxu0 %v7317_v18  ;;  %v9116_v18 = vld [vmem:[#allocation16_spill] sm:$0xff] }
 0x133   :  { %1344 = vmatprep.mubr.f32.mxu0 %v8943_v60 }
 0x136   :  { %1346 = vmatmul.mubr.f32.vlgmr.msra.gmra.mrb[0].mxu0 %v9000_v42 }
 0x137   :  { %5791 = vmatpush1.bf16.msra.mxu0 %v9112_v23  ;;  %1351 = vmatprep.mubr.f32.mxu0 %v8943_v60 }
 0x138   :  { %5793 = vmatprep.subr.bf16.mxu0 %v9113_v41 }
 0x13a   :  { %1353 = vmatmul.mubr.f32.gmra.mrb[2].mxu0 %v9005_v31 }
 0x13b   :  { %1358 = vmatprep.mubr.f32.mxu0 %v8943_v60  ;;  %5795 = vmatpush1.bf16.msra.mxu0 %v9114_v52 }
 0x13c   :  { %5797 = vmatprep.subr.bf16.mxu0 %v9115_v49 }
 0x13e   :  { %1360 = vmatmul.mubr.f32.gmra.mrb[4].mxu0 %v9006_v10 }
 0x13f   :  { %1365 = vmatprep.mubr.f32.mxu0 %v8943_v60  ;;  %5799 = vmatpush1.bf16.msra.mxu0 %v9116_v18 }
 0x140   :  { %5801 = vmatprep.subr.bf16.mxu0 %v9117_v33 }
 0x142   :  { %1367 = vmatmul.mubr.f32.gmra.mrb[6].mxu0 %v9007_v9 }
 0x143   :  { %1372 = vmatprep.mubr.f32.mxu0 %v8943_v60  ;;  %5803 = vmatpush1.bf16.msra.mxu0 %v9118_v43 }
 0x144   :  { %5805 = vmatprep.subr.bf16.mxu0 %v9119_v58 }
 0x146   :  { %1374 = vmatmul.mubr.f32.gmra.mrb[8].mxu0 %v9008_v20 }
 0x147   :  { %1379 = vmatprep.mubr.f32.mxu0 %v8943_v60  ;;  %5807 = vmatpush1.bf16.msra.mxu0 %v9120_v54 }
 0x148   :  { %5809 = vmatprep.subr.bf16.mxu0 %v9121_v61 }
 0x14a   :  { %1381 = vmatmul.mubr.f32.gmra.mrb[10].mxu0 %v9009_v21 }
 0x14b   :  { %1386 = vmatprep.mubr.f32.mxu0 %v8943_v60  ;;  %5811 = vmatpush1.bf16.msra.mxu0 %v9059_v47  ;;  %v7722_v47 = vld [vmem:[%s8676_s3 + $0x8] sm:$0xff] }
 0x14c   :  { %1506 = vmatprep.subr.mxu0 %v9061_v15  ;;  %v7717_v15 = vld [vmem:[%s8676_s3] sm:$0xff]  ;;  %v3005_v27 = vand.u32 4294901760, %v7722_v47 }
 0x14d   :  { %v3002_v53 = vand.u32 4294901760, %v7717_v15 }
 0x14e   :  { %1388 = vmatmul.mubr.f32.gmra.mrb[12].mxu0 %v9012_v5  ;;  %v7953_v49 = vsub.f32 %v7722_v47, %v3005_v27 }
 0x14f   :  { %1393 = vmatprep.mubr.f32.mxu0 %v8943_v60  ;;  %1508 = vmatpush1.msra.mxu0 %v9066_v62  ;;  %v7727_v62 = vld [vmem:[%s8676_s3 + $0x10] sm:$0xff]  ;;  %v7744_v51 = vpack.c.bf16 %v3005_v27, %v3002_v53  ;;  %v7948_v52 = vsub.f32 %v7717_v15, %v3002_v53 }
 0x150   :  { %v3008_v55 = vand.u32 4294901760, %v7727_v62  ;;  %v8853_v33 = vand.u32 4294901760, %v7953_v49 }
 0x151   :  { %5957 = vmatprep.subr.bf16.mxu1 %v7744_v51  ;;  %v8857_v18 = vand.u32 4294901760, %v7948_v52 }
 0x152   :  { %1395 = vmatmul.mubr.f32.gmra.mrb[14].mxu0 %v9015_v57  ;;  %v7750_v46 = vpack.c.bf16 %v3011_v0, %v3008_v55  ;;  %5959 = vmatpush3.bf16.msra.mxu1 %v7744_v51  ;;  %v3253_v58 = vsub.f32 %v7953_v49, %v8853_v33 }
 0x153   :  { %1400 = vmatprep.mubr.f32.mxu0 %v8943_v60  ;;  %v3246_v43 = vsub.f32 %v7948_v52, %v8857_v18 }
 0x154   :  { %5961 = vmatprep.subr.bf16.mxu1 %v7750_v46  ;;  %v3254_v61 = vand.u32 4294901760, %v3253_v58 }
 0x155   :  { %v3247_v54 = vand.u32 4294901760, %v3246_v43 }
 0x156   :  { %1402 = vmatmul.mubr.f32.gmra.mrb[16].mxu0 %v7016_v7  ;;  %5963 = vmatpush3.bf16.msra.mxu1 %v7750_v46 }
 0x157   :  { %1407 = vmatprep.mubr.f32.mxu0 %v8943_v60  ;;  %v7963_v15 = vpack.c.bf16 %v3254_v61, %v3247_v54 }
 0x15a   :  { %1409 = vmatmul.mubr.f32.gmra.mrb[18].mxu0 %v7018_v59 }
 0x15b   :  { %1414 = vmatprep.mubr.f32.mxu0 %v8943_v60 }
 0x15e   :  { %1416 = vmatmul.mubr.f32.gmra.mrb[20].mxu0 %v7094_v6 }
 0x15f   :  { %1421 = vmatprep.mubr.f32.mxu0 %v8943_v60 }
 0x162   :  { %1423 = vmatmul.mubr.f32.gmra.mrb[22].mxu0 %v9017_v45 }
 0x163   :  { %1428 = vmatprep.mubr.f32.mxu0 %v8943_v60 }
 0x166   :  { %1430 = vmatmul.mubr.f32.gmra.mrb[24].mxu0 %v7187_v1 }
 0x167   :  { %1435 = vmatprep.mubr.f32.mxu0 %v8943_v60 }
 0x16a   :  { %1437 = vmatmul.mubr.f32.gmra.mrb[26].mxu0 %v7216_v4 }
 0x16b   :  { %1442 = vmatprep.mubr.f32.mxu0 %v8943_v60 }
 0x16e   :  { %1444 = vmatmul.mubr.f32.gmra.mrb[28].mxu0 %v7261_v32 }
 0x16f   :  { %1449 = vmatprep.mubr.f32.mxu0 %v8943_v60 }
 0x172   :  { %1451 = vmatmul.mubr.f32.gmra.mrb[30].mxu0 %v7293_v48 }
 0x173   :  { %1547 = vmatprep.mubr.f32.mxu0 %v8943_v60 }
 0x176   :  { %1549 = vmatmul.mubr.f32.vlgmr.msra.gmra.mrb[0].mxu0 %v9000_v42  ;;  %v7796_v42 = vld [vmem:[%s8676_s3 + $0x20] sm:$0xff] }
 0x177   :  { %1554 = vmatprep.mubr.f32.mxu0 %v8943_v60 }
 0x17a   :  { %1556 = vmatmul.mubr.f32.gmra.mrb[2].mxu0 %v9005_v31 }
 0x17b   :  { %1561 = vmatprep.mubr.f32.mxu0 %v8943_v60 }
 0x17e   :  { %1563 = vmatmul.mubr.f32.gmra.mrb[4].mxu0 %v9006_v10 }
 0x17f   :  { %1568 = vmatprep.mubr.f32.mxu0 %v8943_v60 }
 0x182   :  { %1570 = vmatmul.mubr.f32.gmra.mrb[6].mxu0 %v9007_v9 }
 0x183   :  { %1575 = vmatprep.mubr.f32.mxu0 %v8943_v60 }
 0x186   :  { %1577 = vmatmul.mubr.f32.gmra.mrb[8].mxu0 %v9008_v20 }
 0x187   :  { %1582 = vmatprep.mubr.f32.mxu0 %v8943_v60 }
 0x18a   :  { %1584 = vmatmul.mubr.f32.gmra.mrb[10].mxu0 %v9009_v21 }
 0x18b   :  { %1589 = vmatprep.mubr.f32.mxu0 %v8943_v60 }
 0x18e   :  { %1591 = vmatmul.mubr.f32.gmra.mrb[12].mxu0 %v9012_v5  ;;  %v7842_v5 = vld [vmem:[%s8676_s3 + $0x40] sm:$0xff] }
 0x18f   :  { %1596 = vmatprep.mubr.f32.mxu0 %v8943_v60 }
 0x192   :  { %1598 = vmatmul.mubr.f32.gmra.mrb[14].mxu0 %v9015_v57  ;;  %v7847_v57 = vld [vmem:[%s8676_s3 + $0x48] sm:$0xff] }
 0x193   :  { %1603 = vmatprep.mubr.f32.mxu0 %v8943_v60  ;;  %v3029_v37 = vand.u32 4294901760, %v7847_v57 }
 0x196   :  { %1605 = vmatmul.mubr.f32.gmra.mrb[16].mxu0 %v7016_v7  ;;  %v3014_v7 = vand.u32 4294901760, %v7796_v42 }
 0x197   :  { %1610 = vmatprep.mubr.f32.mxu0 %v8943_v60 }
 0x198   :  { %v7968_v47 = vsub.f32 %v7796_v42, %v3014_v7 }
 0x19a   :  { %1612 = vmatmul.mubr.f32.gmra.mrb[18].mxu0 %v7018_v59  ;;  %9122 = vst [vmem:[#allocation39_spill] sm:$0xff] %v7968_v47  ;;  %v8856_v27 = vand.u32 4294901760, %v7968_v47 }
 0x19b   :  { %1617 = vmatprep.mubr.f32.mxu0 %v8943_v60 }
 0x19c   :  { %v3274_v43 = vsub.f32 %v7968_v47, %v8856_v27 }
 0x19e   :  { %1619 = vmatmul.mubr.f32.gmra.mrb[20].mxu0 %v7094_v6  ;;  %v7801_v6 = vld [vmem:[%s8676_s3 + $0x28] sm:$0xff] }
 0x19f   :  { %1624 = vmatprep.mubr.f32.mxu0 %v8943_v60  ;;  %v3017_v59 = vand.u32 4294901760, %v7801_v6 }
 0x1a1   :  { %v7973_v53 = vsub.f32 %v7801_v6, %v3017_v59 }
 0x1a2   :  { %1626 = vmatmul.mubr.f32.gmra.mrb[22].mxu0 %v9017_v45  ;;  %v3026_v45 = vand.u32 4294901760, %v7842_v5 }
 0x1a3   :  { %1631 = vmatprep.mubr.f32.mxu0 %v8943_v60  ;;  %9123 = vst [vmem:[#allocation42_spill] sm:$0xff] %v7973_v53  ;;  %v8854_v33 = vand.u32 4294901760, %v7973_v53 }
 0x1a4   :  { %v7859_v56 = vpack.c.bf16 %v3029_v37, %v3026_v45 }
 0x1a6   :  { %1633 = vmatmul.mubr.f32.gmra.mrb[24].mxu0 %v7187_v1 }
 0x1a7   :  { %1638 = vmatprep.mubr.f32.mxu0 %v8943_v60 }
 0x1aa   :  { %1640 = vmatmul.mubr.f32.gmra.mrb[26].mxu0 %v7216_v4 }
 0x1ab   :  { %1645 = vmatprep.mubr.f32.mxu0 %v8943_v60 }
 0x1ae   :  { %1647 = vmatmul.mubr.f32.gmra.mrb[28].mxu0 %v7261_v32  ;;  %v7818_v32 = vld [vmem:[%s8676_s3 + $0x30] sm:$0xff] }
 0x1af   :  { %1652 = vmatprep.mubr.f32.mxu0 %v8943_v60  ;;  %v7811_v60 = vpack.c.bf16 %v3017_v59, %v3014_v7  ;;  %v3020_v31 = vand.u32 4294901760, %v7818_v32  ;;  %v3281_v7 = vsub.f32 %v7973_v53, %v8854_v33  ;;  %v3275_v59 = vand.u32 4294901760, %v3274_v43 }
 0x1b1   :  { %5965 = vmatprep.subr.bf16.mxu1 %v7811_v60  ;;  %v7984_v42 = vsub.f32 %v7818_v32, %v3020_v31  ;;  %v3282_v61 = vand.u32 4294901760, %v3281_v7 }
 0x1b2   :  { %1654 = vmatmul.mubr.f32.gmra.mrb[30].mxu0 %v7293_v48  ;;  %v7823_v48 = vld [vmem:[%s8676_s3 + $0x38] sm:$0xff]  ;;  %5967 = vmatpush3.bf16.msra.mxu1 %v7811_v60 }
 0x1b3   :  { %v3023_v10 = vand.u32 4294901760, %v7823_v48  ;;  %9124 = vst [vmem:[#allocation46_spill] sm:$0xff] %v7984_v42  ;;  %v8855_v58 = vand.u32 4294901760, %v7984_v42  ;;  %v8012_v43 = vpack.c.bf16 %v3282_v61, %v3275_v59 }
 0x1b5   :  { %v7835_v20 = vpack.c.bf16 %v3023_v10, %v3020_v31  ;;  %v7989_v6 = vsub.f32 %v7823_v48, %v3023_v10  ;;  %v3288_v32 = vsub.f32 %v7984_v42, %v8855_v58  ;;  %v8005_v48 = vsub.f32 %v7842_v5, %v3026_v45 }
 0x1b6   :  { %v8010_v10 = vsub.f32 %v7847_v57, %v3029_v37  ;;  %v8027_v57 = vsub.f32 %v7866_v34, %v3032_v12  ;;  %v8032_v37 = vsub.f32 %v7871_v25, %v3035_v44  ;;  %v8044_v34 = vsub.f32 %v7890_v36, %v3038_v19 }
 0x1b7   :  { %5969 = vmatprep.subr.bf16.mxu1 %v7835_v20  ;;  %9125 = vst [vmem:[#allocation51_spill] sm:$0xff] %v7989_v6  ;;  %v8866_v54 = vand.u32 4294901760, %v7989_v6  ;;  %9126 = vst [vmem:[#allocation53_spill] sm:$0xff] %v8005_v48  ;;  %v3289_v7 = vand.u32 4294901760, %v3288_v32  ;;  %v8865_v58 = vand.u32 4294901760, %v8005_v48  ;;  %v8049_v25 = vsub.f32 %v7895_v38, %v3041_v14 }
 0x1b8   :  { %5971 = vmatpush3.bf16.msra.mxu1 %v7835_v20  ;;  %9127 = vst [vmem:[#allocation57_spill] sm:$0xff] %v8010_v10  ;;  %v8864_v27 = vand.u32 4294901760, %v8010_v10  ;;  %9128 = vst [vmem:[#allocation19_spill] sm:$0xff] %v8027_v57  ;;  %v8860_v61 = vand.u32 4294901760, %v8027_v57  ;;  %v8859_v32 = vand.u32 4294901760, %v8032_v37  ;;  %v8065_v38 = vsub.f32 %v7914_v26, %v3044_v39 }
 0x1b9   :  { %5973 = vmatprep.subr.bf16.mxu1 %v7859_v56  ;;  %v3295_v31 = vsub.f32 %v7989_v6, %v8866_v54  ;;  %v3302_v5 = vsub.f32 %v8005_v48, %v8865_v58  ;;  %9129 = vst [vmem:[#allocation21_spill] sm:$0xff] %v8032_v37  ;;  %9130 = vst [vmem:[#allocation63_spill] sm:$0xff] %v8044_v34  ;;  %v8070_v14 = vsub.f32 %v7919_v8, %v3047_v30 }
 0x1ba   :  { %v3309_v45 = vsub.f32 %v8010_v10, %v8864_v27  ;;  %9131 = vst [vmem:[#allocation22_spill] sm:$0xff] %v8049_v25  ;;  %v3323_v12 = vsub.f32 %v8032_v37, %v8859_v32  ;;  %9132 = vst [vmem:[#allocation66_spill] sm:$0xff] %v8065_v38 }
 0x1bb   :  { %v3296_v33 = vand.u32 4294901760, %v3295_v31  ;;  %9133 = vst [vmem:[#allocation75_spill] sm:$0xff] %v8070_v14  ;;  %v8861_v32 = vand.u32 4294901760, %v8070_v14 }
 0x1bc   :  { %5975 = vmatpush3.bf16.msra.mxu1 %v7859_v56  ;;  %v3310_v59 = vand.u32 4294901760, %v3309_v45  ;;  %v8863_v45 = vand.u32 4294901760, %v8049_v25 }
 0x1bd   :  { %5977 = vmatprep.subr.bf16.mxu1 %v7883_v3  ;;  %v8016_v18 = vpack.c.bf16 %v3296_v33, %v3289_v7  ;;  %v3303_v33 = vand.u32 4294901760, %v3302_v5  ;;  %v3316_v7 = vsub.f32 %v8027_v57, %v8860_v61  ;;  %v8858_v5 = vand.u32 4294901760, %v8044_v34 }
 0x1be   :  { %v3337_v19 = vsub.f32 %v8049_v25, %v8863_v45  ;;  %v3351_v39 = vsub.f32 %v8070_v14, %v8861_v32  ;;  %v8131_v32 = vld [vmem:[%s8675_s2] ss:$0 sm:$0xff] }
 0x1bf   :  { %v8036_v31 = vpack.c.bf16 %v3310_v59, %v3303_v33  ;;  %v3317_v44 = vand.u32 4294901760, %v3316_v7  ;;  %v3324_v33 = vand.u32 4294901760, %v3323_v12  ;;  %v3330_v36 = vsub.f32 %v8044_v34, %v8858_v5 }
 0x1c0   :  { %5979 = vmatpush3.bf16.msra.mxu1 %v7883_v3  ;;  %v3338_v12 = vand.u32 4294901760, %v3337_v19  ;;  %v8862_v5 = vand.u32 4294901760, %v8065_v38  ;;  %v3352_v30 = vand.u32 4294901760, %v3351_v39  ;;  %v8098_v19 = vsub.f32 %v7734_v35, %v3011_v0 }
 0x1c1   :  { %5981 = vmatprep.subr.bf16.mxu1 %v7907_v24  ;;  %v8072_v59 = vpack.c.bf16 %v3324_v33, %v3317_v44  ;;  %v3331_v7 = vand.u32 4294901760, %v3330_v36  ;;  %v8088_v33 = vpack.c.bf16 %v7953_v49, %v7948_v52  ;;  %v8093_v36 = vsub.f32 %v7727_v62, %v3008_v55 }
 0x1c2   :  { %v3344_v26 = vsub.f32 %v8065_v38, %v8862_v5  ;;  %9134 = vst [vmem:[#allocation45_spill] sm:$0xff] %v8098_v19  ;;  %v8114_v62 = vpack.c.bf16 %v8010_v10, %v8005_v48  ;;  %v8118_v35 = vpack.c.bf16 %v8032_v37, %v8027_v57  ;;  %v8122_v55 = vpack.c.bf16 %v8049_v25, %v8044_v34 }
 0x1c3   :  { %v8076_v61 = vpack.c.bf16 %v3338_v12, %v3331_v7  ;;  %v8102_v7 = vpack.c.bf16 %v8098_v19, %v8093_v36  ;;  %v8106_v12 = vpack.c.bf16 %v7973_v53, %v7968_v47  ;;  %v8126_v0 = vpack.c.bf16 %v8070_v14, %v8065_v38 }
 0x1c4   :  { %5983 = vmatpush3.bf16.msra.mxu1 %v7907_v24  ;;  %v3345_v8 = vand.u32 4294901760, %v3344_v26  ;;  %v8110_v26 = vpack.c.bf16 %v7989_v6, %v7984_v42  ;;  %v8874_v37 = vand.u32 4294901760, %v8093_v36 }
 0x1c5   :  { %5985 = vmatprep.subr.bf16.mxu1 %v7931_v28 }
 0x1c6   :  { %v8084_v44 = vpack.c.bf16 %v3352_v30, %v3345_v8 }
 0x1c7   :  { %v7805_v1 = vpop.f32.mrb[0].mxu1 }
 0x1c8   :  { %v7813_v4 = vpop.f32.mrb[1].mxu1  ;;  %5987 = vmatpush3.bf16.msra.mxu1 %v7931_v28 }
 0x1c9   :  { %5989 = vmatprep.subr.bf16.mxu1 %v7963_v15 }
 0x1cb   :  { %v7829_v9 = vpop.f32.mrb[2].mxu1 }
 0x1cc   :  { %v7837_v21 = vpop.f32.mrb[3].mxu1 }
 0x1cf   :  { %v7853_v2 = vpop.f32.mrb[4].mxu1 }
 0x1d0   :  { %v7861_v17 = vpop.f32.mrb[5].mxu1 }
 0x1d3   :  { %v7877_v50 = vpop.f32.mrb[6].mxu1 }
 0x1d4   :  { %v7885_v16 = vpop.f32.mrb[7].mxu1 }
 0x1d7   :  { %v7901_v22 = vpop.f32.mrb[8].mxu1 }
 0x1d8   :  { %v7909_v63 = vpop.f32.mrb[9].mxu1 }
 0x1db   :  { %v7925_v11 = vpop.f32.mrb[10].mxu1 }
 0x1dc   :  { %v7933_v13 = vpop.f32.mrb[11].mxu1 }
 0x1df   :  { %v7937_v29 = vpop.f32.mrb[12].mxu1 }
 0x1e0   :  { %v7939_v40 = vpop.f32.mrb[13].mxu1 }
 0x1e3   :  { %v7941_v23 = vpop.f32.mrb[14].mxu1 }
 0x1e4   :  { %v7943_v41 = vpop.f32.mrb[15].mxu1 }
 0x249   :  { %v1550_v39 = vpop.f32.mrb[0].mxu0 }
 0x24a   :  { %v1552_v8 = vpop.f32.mrb[1].mxu0 }
 0x24b   :  { %v2907_v30 = vmax.f32 %v1550_v39, %v1552_v8  ;;  %v8876_v39 = vand.u32 4294901760, %v8098_v19 }
 0x24d   :  { %v2923_v5 = vmax.f32 %v2907_v30, %v7813_v4  ;;  %v1557_v45 = vpop.f32.mrb[2].mxu0 }
 0x24e   :  { %v1559_v27 = vpop.f32.mrb[3].mxu0 }
 0x24f   :  { %v2946_v58 = vadd.f32 %v8131_v32, %v2923_v5  ;;  %v2908_v54 = vmax.f32 %v1557_v45, %v1559_v27 }
 0x251   :  { %v2962_v25 = vmax.f32 %v2946_v58, 0.0  ;;  %v2924_v34 = vmax.f32 %v2908_v54, %v7805_v1  ;;  %v1564_v14 = vpop.f32.mrb[4].mxu0  ;;  %v3260_v1 = vsub.f32 %v8093_v36, %v8874_v37  ;;  %v3267_v54 = vsub.f32 %v8098_v19, %v8876_v39 }
 0x252   :  { %v1566_v38 = vpop.f32.mrb[5].mxu0 }
 0x253   :  { %v8138_v8 = vand.u32 4294901760, %v2962_v25  ;;  %v2947_v57 = vadd.f32 %v8131_v32, %v2924_v34  ;;  %v2909_v10 = vmax.f32 %v1564_v14, %v1566_v38  ;;  %v3261_v39 = vand.u32 4294901760, %v3260_v1 }
 0x254   :  { %v3268_v6 = vand.u32 4294901760, %v3267_v54 }
 0x255   :  { %v8142_v4 = vsub.f32 %v2962_v25, %v8138_v8  ;;  %v2963_v30 = vmax.f32 %v2947_v57, 0.0  ;;  %v2925_v27 = vmax.f32 %v2909_v10, %v7837_v21  ;;  %v1571_v58 = vpop.f32.mrb[6].mxu0 }
 0x256   :  { %v1573_v5 = vpop.f32.mrb[7].mxu0  ;;  %v5992_v53 = vpack.c.bf16 %v3268_v6, %v3261_v39 }
 0x257   :  { %v8151_v45 = vand.u32 4294901760, %v2963_v30  ;;  %v2948_v34 = vadd.f32 %v8131_v32, %v2925_v27  ;;  %v2910_v38 = vmax.f32 %v1571_v58, %v1573_v5  ;;  %v8879_v25 = vand.u32 4294901760, %v8142_v4 }
 0x259   :  { %v8156_v57 = vsub.f32 %v2963_v30, %v8151_v45  ;;  %v2964_v21 = vmax.f32 %v2948_v34, 0.0  ;;  %v2926_v10 = vmax.f32 %v2910_v38, %v7829_v9  ;;  %v1578_v14 = vpop.f32.mrb[8].mxu0  ;;  %v3085_v37 = vsub.f32 %v8142_v4, %v8879_v25 }
 0x25a   :  { %v1580_v48 = vpop.f32.mrb[9].mxu0 }
 0x25b   :  { %v8882_v42 = vand.u32 4294901760, %v8156_v57  ;;  %v8163_v27 = vand.u32 4294901760, %v2964_v21  ;;  %v2949_v58 = vadd.f32 %v8131_v32, %v2926_v10  ;;  %v2911_v5 = vmax.f32 %v1578_v14, %v1580_v48 }
 0x25c   :  { %v3086_v30 = vand.u32 4294901760, %v3085_v37 }
 0x25d   :  { %v3095_v9 = vsub.f32 %v8156_v57, %v8882_v42  ;;  %v8170_v34 = vsub.f32 %v2964_v21, %v8163_v27  ;;  %v2965_v38 = vmax.f32 %v2949_v58, 0.0  ;;  %v2927_v25 = vmax.f32 %v2911_v5, %v7861_v17  ;;  %v1585_v1 = vpop.f32.mrb[10].mxu0 }
 0x25e   :  { %5364 = vmatprep.mubr.f32.mxu1 %v3086_v30  ;;  %v1587_v54 = vpop.f32.mrb[11].mxu0 }
 0x25f   :  { %v8173_v47 = vand.u32 4294901760, %v2965_v38  ;;  %v2950_v10 = vadd.f32 %v8131_v32, %v2927_v25  ;;  %v2912_v48 = vmax.f32 %v1585_v1, %v1587_v54  ;;  %v3096_v37 = vand.u32 4294901760, %v3095_v9 }
 0x260   :  { %v3104_v14 = vand.u32 4294901760, %v8170_v34 }
 0x261   :  { %v8178_v42 = vsub.f32 %v2965_v38, %v8173_v47  ;;  %v2966_v21 = vmax.f32 %v2950_v10, 0.0  ;;  %v2928_v58 = vmax.f32 %v2912_v48, %v7853_v2  ;;  %v1592_v19 = vpop.f32.mrb[12].mxu0  ;;  %5365 = vmatmul.mubr.f32.vlgmr.msra.gmra.mrb[16].mxu1 %v3096_v37 }
 0x262   :  { %v1594_v17 = vpop.f32.mrb[13].mxu0  ;;  %v3105_v6 = vsub.f32 %v8170_v34, %v3104_v14  ;;  %5991 = vmatpush3.bf16.msra.mxu1 %v7963_v15 }
 0x263   :  { %v8185_v39 = vand.u32 4294901760, %v2966_v21  ;;  %v2951_v25 = vadd.f32 %v8131_v32, %v2928_v58  ;;  %v2913_v5 = vmax.f32 %v1592_v19, %v1594_v17  ;;  %v8891_v30 = vand.u32 4294901760, %v8178_v42  ;;  %5993 = vmatprep.subr.bf16.mxu1 %v5992_v53 }
 0x264   :  { %v3106_v9 = vand.u32 4294901760, %v3105_v6 }
 0x265   :  { %v8190_v2 = vsub.f32 %v2966_v21, %v8185_v39  ;;  %v2967_v38 = vmax.f32 %v2951_v25, 0.0  ;;  %v2929_v1 = vmax.f32 %v2913_v5, %v7885_v16  ;;  %v1599_v54 = vpop.f32.mrb[14].mxu0  ;;  %v3115_v15 = vsub.f32 %v8178_v42, %v8891_v30 }
 0x266   :  { %5367 = vmatprep.mubr.f32.mxu1 %v3106_v9  ;;  %v1601_v10 = vpop.f32.mrb[15].mxu0  ;;  %5995 = vmatpush3.bf16.msra.mxu1 %v5992_v53 }
 0x267   :  { %v8196_v48 = vand.u32 4294901760, %v2967_v38  ;;  %v2952_v19 = vadd.f32 %v8131_v32, %v2929_v1  ;;  %v2914_v37 = vmax.f32 %v1599_v54, %v1601_v10  ;;  %v3116_v58 = vand.u32 4294901760, %v3115_v15  ;;  %5997 = vmatprep.subr.bf16.mxu1 %v8012_v43 }
 0x268   :  { %v8889_v21 = vand.u32 4294901760, %v8190_v2 }
 0x269   :  { %v8202_v16 = vsub.f32 %v2967_v38, %v8196_v48  ;;  %v2968_v17 = vmax.f32 %v2952_v19, 0.0  ;;  %v2930_v6 = vmax.f32 %v2914_v37, %v7877_v50  ;;  %v1606_v25 = vpop.f32.mrb[16].mxu0  ;;  %5368 = vmatmul.mubr.f32.gmra.mrb[18].mxu1 %v3116_v58 }
 0x26a   :  { %v1608_v5 = vpop.f32.mrb[17].mxu0  ;;  %v3125_v53 = vsub.f32 %v8190_v2, %v8889_v21  ;;  %5999 = vmatpush3.bf16.msra.mxu1 %v8012_v43 }
 0x26b   :  { %v8209_v9 = vand.u32 4294901760, %v2968_v17  ;;  %v2953_v1 = vadd.f32 %v8131_v32, %v2930_v6  ;;  %v2915_v54 = vmax.f32 %v1606_v25, %v1608_v5  ;;  %v8884_v38 = vand.u32 4294901760, %v8202_v16  ;;  %6001 = vmatprep.subr.bf16.mxu1 %v8016_v18 }
 0x26c   :  { %v3126_v15 = vand.u32 4294901760, %v3125_v53 }
 0x26d   :  { %v8215_v50 = vsub.f32 %v2968_v17, %v8209_v9  ;;  %v2969_v10 = vmax.f32 %v2953_v1, 0.0  ;;  %v2931_v19 = vmax.f32 %v2915_v54, %v7909_v63  ;;  %v1613_v37 = vpop.f32.mrb[18].mxu0  ;;  %v3135_v43 = vsub.f32 %v8202_v16, %v8884_v38 }
 0x26e   :  { %5370 = vmatprep.mubr.f32.mxu1 %v3126_v15  ;;  %v1615_v58 = vpop.f32.mrb[19].mxu0  ;;  %6003 = vmatpush3.bf16.msra.mxu1 %v8016_v18 }
 0x26f   :  { %v8222_v6 = vand.u32 4294901760, %v2969_v10  ;;  %v2954_v25 = vadd.f32 %v8131_v32, %v2931_v19  ;;  %v2916_v5 = vmax.f32 %v1613_v37, %v1615_v58  ;;  %v3136_v53 = vand.u32 4294901760, %v3135_v43  ;;  %6005 = vmatprep.subr.bf16.mxu1 %v8036_v31 }
 0x270   :  { %v8885_v17 = vand.u32 4294901760, %v8215_v50 }
 0x271   :  { %v8228_v63 = vsub.f32 %v2969_v10, %v8222_v6  ;;  %v2970_v1 = vmax.f32 %v2954_v25, 0.0  ;;  %v2932_v54 = vmax.f32 %v2916_v5, %v7901_v22  ;;  %v1620_v15 = vpop.f32.mrb[20].mxu0  ;;  %5371 = vmatmul.mubr.f32.gmra.mrb[20].mxu1 %v3136_v53 }
 0x272   :  { %v1622_v38 = vpop.f32.mrb[21].mxu0  ;;  %v3145_v18 = vsub.f32 %v8215_v50, %v8885_v17  ;;  %6007 = vmatpush3.bf16.msra.mxu1 %v8036_v31 }
 0x273   :  { %v8235_v19 = vand.u32 4294901760, %v2970_v1  ;;  %v2955_v37 = vadd.f32 %v8131_v32, %v2932_v54  ;;  %v2917_v43 = vmax.f32 %v1620_v15, %v1622_v38  ;;  %v8886_v10 = vand.u32 4294901760, %v8228_v63  ;;  %6009 = vmatprep.subr.bf16.mxu1 %v8072_v59 }
 0x274   :  { %v3146_v58 = vand.u32 4294901760, %v3145_v18 }
 0x275   :  { %v8241_v22 = vsub.f32 %v2970_v1, %v8235_v19  ;;  %v2971_v25 = vmax.f32 %v2955_v37, 0.0  ;;  %v2933_v5 = vmax.f32 %v2917_v43, %v7933_v13  ;;  %v1627_v53 = vpop.f32.mrb[22].mxu0  ;;  %v3155_v31 = vsub.f32 %v8228_v63, %v8886_v10 }
 0x276   :  { %5373 = vmatprep.mubr.f32.mxu1 %v3146_v58  ;;  %v1629_v17 = vpop.f32.mrb[23].mxu0  ;;  %6011 = vmatpush3.bf16.msra.mxu1 %v8072_v59 }
 0x277   :  { %v8248_v38 = vand.u32 4294901760, %v2971_v25  ;;  %v2956_v54 = vadd.f32 %v8131_v32, %v2933_v5  ;;  %v2918_v15 = vmax.f32 %v1627_v53, %v1629_v17  ;;  %v3156_v18 = vand.u32 4294901760, %v3155_v31  ;;  %6013 = vmatprep.subr.bf16.mxu1 %v8076_v61 }
 0x278   :  { %v8887_v1 = vand.u32 4294901760, %v8241_v22 }
 0x279   :  { %v8254_v13 = vsub.f32 %v2971_v25, %v8248_v38  ;;  %v2972_v37 = vmax.f32 %v2956_v54, 0.0  ;;  %v2934_v43 = vmax.f32 %v2918_v15, %v7925_v11  ;;  %v1634_v58 = vpop.f32.mrb[24].mxu0  ;;  %5374 = vmatmul.mubr.f32.gmra.mrb[22].mxu1 %v3156_v18 }
 0x27a   :  { %v1636_v10 = vpop.f32.mrb[25].mxu0  ;;  %v3165_v59 = vsub.f32 %v8241_v22, %v8887_v1  ;;  %6015 = vmatpush3.bf16.msra.mxu1 %v8076_v61 }
 0x27b   :  { %v8261_v17 = vand.u32 4294901760, %v2972_v37  ;;  %v2957_v5 = vadd.f32 %v8131_v32, %v2934_v43  ;;  %v2919_v53 = vmax.f32 %v1634_v58, %v1636_v10  ;;  %v8888_v25 = vand.u32 4294901760, %v8254_v13  ;;  %6017 = vmatprep.subr.bf16.mxu1 %v8084_v44 }
 0x27c   :  { %v3166_v31 = vand.u32 4294901760, %v3165_v59 }
 0x27d   :  { %v8267_v11 = vsub.f32 %v2972_v37, %v8261_v17  ;;  %v2973_v54 = vmax.f32 %v2957_v5, 0.0  ;;  %v2935_v15 = vmax.f32 %v2919_v53, %v7939_v40  ;;  %v1641_v18 = vpop.f32.mrb[26].mxu0  ;;  %v3175_v61 = vsub.f32 %v8254_v13, %v8888_v25 }
 0x27e   :  { %5376 = vmatprep.mubr.f32.mxu1 %v3166_v31  ;;  %v1643_v1 = vpop.f32.mrb[27].mxu0  ;;  %6019 = vmatpush3.bf16.msra.mxu1 %v8084_v44 }
 0x27f   :  { %v8274_v10 = vand.u32 4294901760, %v2973_v54  ;;  %v2958_v43 = vadd.f32 %v8131_v32, %v2935_v15  ;;  %v2920_v58 = vmax.f32 %v1641_v18, %v1643_v1  ;;  %v3176_v59 = vand.u32 4294901760, %v3175_v61  ;;  %6021 = vmatprep.subr.bf16.mxu1 %v8088_v33 }
 0x280   :  { %v8890_v37 = vand.u32 4294901760, %v8267_v11 }
 0x281   :  { %v8280_v40 = vsub.f32 %v2973_v54, %v8274_v10  ;;  %v2974_v5 = vmax.f32 %v2958_v43, 0.0  ;;  %v2936_v53 = vmax.f32 %v2920_v58, %v7937_v29  ;;  %v1648_v31 = vpop.f32.mrb[28].mxu0  ;;  %5377 = vmatmul.mubr.f32.gmra.mrb[24].mxu1 %v3176_v59 }
 0x282   :  { %v1650_v25 = vpop.f32.mrb[29].mxu0  ;;  %v3185_v44 = vsub.f32 %v8267_v11, %v8890_v37 }
 0x283   :  { %v8286_v15 = vand.u32 4294901760, %v2974_v5  ;;  %v2959_v1 = vadd.f32 %v8131_v32, %v2936_v53  ;;  %v2921_v18 = vmax.f32 %v1648_v31, %v1650_v25  ;;  %v8892_v61 = vand.u32 4294901760, %v8280_v40 }
 0x284   :  { %v3186_v21 = vand.u32 4294901760, %v3185_v44 }
 0x285   :  { %v8291_v54 = vsub.f32 %v2974_v5, %v8286_v15  ;;  %v2975_v43 = vmax.f32 %v2959_v1, 0.0  ;;  %v2937_v29 = vmax.f32 %v2921_v18, %v7943_v41  ;;  %v1655_v58 = vpop.f32.mrb[30].mxu0  ;;  %v3195_v59 = vsub.f32 %v8280_v40, %v8892_v61 }
 0x286   :  { %5379 = vmatprep.mubr.f32.mxu1 %v3186_v21  ;;  %v1657_v37 = vpop.f32.mrb[31].mxu0 }
 0x287   :  { %v8297_v30 = vand.u32 4294901760, %v2975_v43  ;;  %v2960_v25 = vadd.f32 %v8131_v32, %v2937_v29  ;;  %v2922_v53 = vmax.f32 %v1655_v58, %v1657_v37  ;;  %v3196_v31 = vand.u32 4294901760, %v3195_v59 }
 0x288   :  { %v3204_v44 = vand.u32 4294901760, %v8291_v54 }
 0x289   :  { %v8302_v5 = vsub.f32 %v2975_v43, %v8297_v30  ;;  %v2976_v1 = vmax.f32 %v2960_v25, 0.0  ;;  %v2938_v41 = vmax.f32 %v2922_v53, %v7941_v23  ;;  %5380 = vmatmul.mubr.f32.gmra.mrb[26].mxu1 %v3196_v31 }
 0x28a   :  { %v3205_v21 = vsub.f32 %v8291_v54, %v3204_v44 }
 0x28b   :  { %v8308_v18 = vand.u32 4294901760, %v2976_v1  ;;  %v2961_v61 = vadd.f32 %v8131_v32, %v2938_v41  ;;  %v3214_v37 = vand.u32 4294901760, %v8302_v5 }
 0x28c   :  { %v3206_v29 = vand.u32 4294901760, %v3205_v21 }
 0x28d   :  { %v8313_v58 = vsub.f32 %v2976_v1, %v8308_v18  ;;  %v2977_v43 = vmax.f32 %v2961_v61, 0.0  ;;  %v3215_v23 = vsub.f32 %v8302_v5, %v3214_v37 }
 0x28e   :  { %5382 = vmatprep.mubr.f32.mxu1 %v3206_v29  ;;  %v9141_v29 = vand.u32 4294901760, %v8156_v57 }
 0x28f   :  { %v8318_v59 = vand.u32 4294901760, %v2977_v43  ;;  %v3216_v25 = vand.u32 4294901760, %v3215_v23  ;;  %v3224_v53 = vand.u32 4294901760, %v8313_v58 }
 0x291   :  { %v8322_v31 = vsub.f32 %v2977_v43, %v8318_v59  ;;  %5383 = vmatmul.mubr.f32.gmra.mrb[28].mxu1 %v3216_v25  ;;  %v3225_v32 = vsub.f32 %v8313_v58, %v3224_v53  ;;  %v9144_v43 = vld [vmem:[#allocation42_spill] sm:$0xff]  ;;  %v9146_v25 = vand.u32 4294901760, %v8178_v42 }
 0x292   :  { %v9145_v23 = vand.u32 4294901760, %v9144_v43  ;;  %v9168_v43 = vld [vmem:[#allocation22_spill] sm:$0xff] }
 0x293   :  { %v3226_v1 = vand.u32 4294901760, %v3225_v32  ;;  %v3234_v61 = vand.u32 4294901760, %v8322_v31 }
 0x295   :  { %5385 = vmatprep.mubr.f32.mxu1 %v3226_v1  ;;  %v3235_v41 = vsub.f32 %v8322_v31, %v3234_v61  ;;  %v9150_v1 = vld [vmem:[#allocation51_spill] sm:$0xff] }
 0x297   :  { %v3236_v21 = vand.u32 4294901760, %v3235_v41  ;;  %v9152_v41 = vand.u32 4294901760, %v8202_v16 }
 0x299   :  { %5386 = vmatmul.mubr.f32.gmra.mrb[30].mxu1 %v3236_v21  ;;  %v9153_v21 = vand.u32 4294901760, %v8215_v50 }
 0x29a   :  { %5420 = vmatprep.mubr.f32.mxu1 %v8138_v8 }
 0x29d   :  { %5421 = vmatmul.mubr.f32.vlgmr.msra.gmra.mrb[16].mxu1 %v8151_v45 }
 0x29e   :  { %5423 = vmatprep.mubr.f32.mxu1 %v8163_v27  ;;  %6023 = vmatpush3.bf16.msra.mxu1 %v8088_v33  ;;  %v9135_v33 = vand.u32 4294901760, %v7948_v52  ;;  %v9142_v52 = vld [vmem:[#allocation39_spill] sm:$0xff] }
 0x29f   :  { %6025 = vmatprep.subr.bf16.mxu1 %v8102_v7 }
 0x2a1   :  { %5424 = vmatmul.mubr.f32.gmra.mrb[18].mxu1 %v8173_v47 }
 0x2a2   :  { %5426 = vmatprep.mubr.f32.mxu1 %v8185_v39  ;;  %6027 = vmatpush3.bf16.msra.mxu1 %v8102_v7  ;;  %v9136_v7 = vand.u32 4294901760, %v7953_v49  ;;  %v9143_v49 = vand.u32 4294901760, %v9142_v52  ;;  %v9165_v52 = vand.u32 4294901760, %v8267_v11 }
 0x2a3   :  { %6029 = vmatprep.subr.bf16.mxu1 %v8106_v12 }
 0x2a5   :  { %5427 = vmatmul.mubr.f32.gmra.mrb[20].mxu1 %v8196_v48 }
 0x2a6   :  { %5429 = vmatprep.mubr.f32.mxu1 %v8209_v9  ;;  %6031 = vmatpush3.bf16.msra.mxu1 %v8106_v12  ;;  %v6084_v12 = vpack.c.bf16 %v9136_v7, %v9135_v33  ;;  %v9156_v7 = vld [vmem:[#allocation57_spill] sm:$0xff] }
 0x2a7   :  { %6033 = vmatprep.subr.bf16.mxu1 %v8110_v26 }
 0x2a9   :  { %5430 = vmatmul.mubr.f32.gmra.mrb[22].mxu1 %v8222_v6 }
 0x2aa   :  { %5432 = vmatprep.mubr.f32.mxu1 %v8235_v19  ;;  %6035 = vmatpush3.bf16.msra.mxu1 %v8110_v26  ;;  %v9137_v26 = vand.u32 4294901760, %v8142_v4 }
 0x2ab   :  { %6037 = vmatprep.subr.bf16.mxu1 %v8114_v62 }
 0x2ad   :  { %5433 = vmatmul.mubr.f32.gmra.mrb[24].mxu1 %v8248_v38 }
 0x2ae   :  { %5435 = vmatprep.mubr.f32.mxu1 %v8261_v17  ;;  %6039 = vmatpush3.bf16.msra.mxu1 %v8114_v62  ;;  %v9138_v62 = vand.u32 4294901760, %v8093_v36  ;;  %v9147_v36 = vand.u32 4294901760, %v8190_v2 }
 0x2af   :  { %6041 = vmatprep.subr.bf16.mxu1 %v8118_v35 }
 0x2b1   :  { %5436 = vmatmul.mubr.f32.gmra.mrb[26].mxu1 %v8274_v10 }
 0x2b2   :  { %5438 = vmatprep.mubr.f32.mxu1 %v8286_v15  ;;  %6043 = vmatpush3.bf16.msra.mxu1 %v8118_v35  ;;  %v9139_v35 = vld [vmem:[#allocation45_spill] sm:$0xff] }
 0x2b3   :  { %6045 = vmatprep.subr.bf16.mxu1 %v8122_v55 }
 0x2b5   :  { %5439 = vmatmul.mubr.f32.gmra.mrb[28].mxu1 %v8297_v30 }
 0x2b6   :  { %5441 = vmatprep.mubr.f32.mxu1 %v8308_v18  ;;  %6047 = vmatpush3.bf16.msra.mxu1 %v8122_v55  ;;  %v9140_v55 = vand.u32 4294901760, %v9139_v35 }
 0x2b7   :  { %6049 = vmatprep.subr.bf16.mxu1 %v8126_v0 }
 0x2b9   :  { %5442 = vmatmul.mubr.f32.gmra.mrb[30].mxu1 %v8318_v59 }
 0x2ba   :  { %6051 = vmatpush3.bf16.msra.mxu1 %v8126_v0  ;;  %5476 = vmatprep.mubr.f32.mxu1 %v8142_v4  ;;  %v6088_v0 = vpack.c.bf16 %v9140_v55, %v9138_v62  ;;  %v6092_v4 = vpack.c.bf16 %v9145_v23, %v9143_v49  ;;  %v9159_v62 = vand.u32 4294901760, %v8241_v22  ;;  %v9162_v55 = vld [vmem:[#allocation21_spill] sm:$0xff] }
 0x2bb   :  { %6053 = vmatprep.subr.bf16.mxu1 %v7744_v51 }
 0x2bd   :  { %5477 = vmatmul.mubr.f32.vlgmr.msra.gmra.mrb[16].mxu1 %v8156_v57  ;;  %v9148_v57 = vld [vmem:[#allocation46_spill] sm:$0xff] }
 0x2be   :  { %5479 = vmatprep.mubr.f32.mxu1 %v8170_v34  ;;  %6055 = vmatpush3.bf16.msra.mxu1 %v7744_v51  ;;  %v9149_v32 = vand.u32 4294901760, %v9148_v57  ;;  %v9151_v34 = vand.u32 4294901760, %v9150_v1 }
 0x2bf   :  { %6057 = vmatprep.subr.bf16.mxu1 %v7750_v46 }
 0x2c1   :  { %5480 = vmatmul.mubr.f32.gmra.mrb[18].mxu1 %v8178_v42  ;;  %v9154_v42 = vld [vmem:[#allocation53_spill] sm:$0xff] }
 0x2c2   :  { %5482 = vmatprep.mubr.f32.mxu1 %v8190_v2  ;;  %6059 = vmatpush3.bf16.msra.mxu1 %v7750_v46  ;;  %v9155_v33 = vand.u32 4294901760, %v9154_v42  ;;  %v9157_v2 = vand.u32 4294901760, %v9156_v7 }
 0x2c3   :  { %6061 = vmatprep.subr.bf16.mxu1 %v7811_v60 }
 0x2c5   :  { %5483 = vmatmul.mubr.f32.gmra.mrb[20].mxu1 %v8202_v16  ;;  %v9160_v16 = vld [vmem:[#allocation19_spill] sm:$0xff] }
 0x2c6   :  { %5485 = vmatprep.mubr.f32.mxu1 %v8215_v50  ;;  %6063 = vmatpush3.bf16.msra.mxu1 %v7811_v60  ;;  %v9161_v35 = vand.u32 4294901760, %v9160_v16  ;;  %v9163_v50 = vand.u32 4294901760, %v9162_v55 }
 0x2c7   :  { %6065 = vmatprep.subr.bf16.mxu1 %v7835_v20 }
 0x2c9   :  { %5486 = vmatmul.mubr.f32.gmra.mrb[22].mxu1 %v8228_v63 }
 0x2ca   :  { %5488 = vmatprep.mubr.f32.mxu1 %v8241_v22  ;;  %6067 = vmatpush3.bf16.msra.mxu1 %v7835_v20  ;;  %v9169_v22 = vand.u32 4294901760, %v9168_v43 }
 0x2cb   :  { %6069 = vmatprep.subr.bf16.mxu1 %v7859_v56 }
 0x2cd   :  { %5489 = vmatmul.mubr.f32.gmra.mrb[24].mxu1 %v8254_v13 }
 0x2ce   :  { %5491 = vmatprep.mubr.f32.mxu1 %v8267_v11  ;;  %6071 = vmatpush3.bf16.msra.mxu1 %v7859_v56 }
 0x2cf   :  { %6073 = vmatprep.subr.bf16.mxu1 %v7883_v3 }
 0x2d1   :  { %5492 = vmatmul.mubr.f32.gmra.mrb[26].mxu1 %v8280_v40 }
 0x2d2   :  { %5494 = vmatprep.mubr.f32.mxu1 %v8291_v54  ;;  %6075 = vmatpush3.bf16.msra.mxu1 %v7883_v3 }
 0x2d3   :  { %6077 = vmatprep.subr.bf16.mxu1 %v7907_v24 }
 0x2d5   :  { %5495 = vmatmul.mubr.f32.gmra.mrb[28].mxu1 %v8302_v5 }
 0x2d6   :  { %5497 = vmatprep.mubr.f32.mxu1 %v8313_v58  ;;  %6079 = vmatpush3.bf16.msra.mxu1 %v7907_v24 }
 0x2d7   :  { %6081 = vmatprep.subr.bf16.mxu1 %v7931_v28 }
 0x2d9   :  { %5498 = vmatmul.mubr.f32.gmra.mrb[30].mxu1 %v8322_v31 }
 0x2da   :  { %6083 = vmatpush3.bf16.msra.mxu1 %v7931_v28  ;;  %5532 = vmatprep.mubr.f32.mxu1 %v9137_v26  ;;  %v9158_v26 = vand.u32 4294901760, %v8228_v63  ;;  %v9166_v63 = vld [vmem:[#allocation63_spill] sm:$0xff] }
 0x2db   :  { %6085 = vmatprep.subr.bf16.mxu1 %v6084_v12  ;;  %v9167_v49 = vand.u32 4294901760, %v9166_v63 }
 0x2dd   :  { %5533 = vmatmul.mubr.f32.vlgmr.msra.gmra.mrb[16].mxu1 %v9141_v29  ;;  %v9164_v29 = vand.u32 4294901760, %v8254_v13  ;;  %v6108_v23 = vpack.c.bf16 %v9169_v22, %v9167_v49  ;;  %v9171_v13 = vld [vmem:[#allocation66_spill] sm:$0xff] }
 0x2de   :  { %5535 = vmatprep.mubr.f32.mxu1 %v3104_v14  ;;  %6087 = vmatpush3.bf16.msra.mxu1 %v6084_v12  ;;  %v6096_v14 = vpack.c.bf16 %v9151_v34, %v9149_v32  ;;  %v6100_v12 = vpack.c.bf16 %v9157_v2, %v9155_v33 }
 0x2df   :  { %6089 = vmatprep.subr.bf16.mxu1 %v6088_v0 }
 0x2e1   :  { %5536 = vmatmul.mubr.f32.gmra.mrb[18].mxu1 %v9146_v25  ;;  %v9172_v25 = vand.u32 4294901760, %v9171_v13 }
 0x2e2   :  { %5538 = vmatprep.mubr.f32.mxu1 %v9147_v36  ;;  %6091 = vmatpush3.bf16.msra.mxu1 %v6088_v0  ;;  %v6104_v0 = vpack.c.bf16 %v9163_v50, %v9161_v35  ;;  %v9173_v36 = vld [vmem:[#allocation75_spill] sm:$0xff] }
 0x2e3   :  { %6093 = vmatprep.subr.bf16.mxu1 %v6092_v4  ;;  %v9174_v11 = vand.u32 4294901760, %v9173_v36 }
 0x2e5   :  { %5539 = vmatmul.mubr.f32.gmra.mrb[20].mxu1 %v9152_v41  ;;  %v6112_v57 = vpack.c.bf16 %v9174_v11, %v9172_v25 }
 0x2e6   :  { %5541 = vmatprep.mubr.f32.mxu1 %v9153_v21  ;;  %6095 = vmatpush3.bf16.msra.mxu1 %v6092_v4  ;;  %v9170_v4 = vand.u32 4294901760, %v8280_v40 }
 0x2e7   :  { %6097 = vmatprep.subr.bf16.mxu1 %v6096_v14 }
 0x2e9   :  { %5542 = vmatmul.mubr.f32.gmra.mrb[22].mxu1 %v9158_v26 }
 0x2ea   :  { %5544 = vmatprep.mubr.f32.mxu1 %v9159_v62  ;;  %6099 = vmatpush3.bf16.msra.mxu1 %v6096_v14 }
 0x2eb   :  { %6101 = vmatprep.subr.bf16.mxu1 %v6100_v12 }
 0x2ed   :  { %5545 = vmatmul.mubr.f32.gmra.mrb[24].mxu1 %v9164_v29 }
 0x2ee   :  { %5547 = vmatprep.mubr.f32.mxu1 %v9165_v52  ;;  %6103 = vmatpush3.bf16.msra.mxu1 %v6100_v12 }
 0x2ef   :  { %6105 = vmatprep.subr.bf16.mxu1 %v6104_v0 }
 0x2f1   :  { %5548 = vmatmul.mubr.f32.gmra.mrb[26].mxu1 %v9170_v4 }
 0x2f2   :  { %5550 = vmatprep.mubr.f32.mxu1 %v3204_v44  ;;  %6107 = vmatpush3.bf16.msra.mxu1 %v6104_v0 }
 0x2f3   :  { %6109 = vmatprep.subr.bf16.mxu1 %v6108_v23 }
 0x2f5   :  { %5551 = vmatmul.mubr.f32.gmra.mrb[28].mxu1 %v3214_v37 }
 0x2f6   :  { %5553 = vmatprep.mubr.f32.mxu1 %v3224_v53  ;;  %6111 = vmatpush3.bf16.msra.mxu1 %v6108_v23 }
 0x2f7   :  { %6113 = vmatprep.subr.bf16.mxu1 %v6112_v57 }
 0x2f9   :  { %5554 = vmatmul.mubr.f32.gmra.mrb[30].mxu1 %v3234_v61 }
 0x2fa   :  { %6115 = vmatpush3.bf16.msra.mxu1 %v6112_v57  ;;  %5588 = vmatprep.mubr.f32.mxu1 %v8138_v8 }
 0x2fb   :  { %6117 = vmatprep.subr.bf16.mxu1 %v7744_v51 }
 0x2fd   :  { %5589 = vmatmul.mubr.f32.vlgmr.msra.gmra.mrb[16].mxu1 %v8151_v45 }
 0x2fe   :  { %5591 = vmatprep.mubr.f32.mxu1 %v8163_v27  ;;  %6119 = vmatpush3.bf16.msra.mxu1 %v7744_v51  ;;  %v4665_v51 = vld [vmem:[%s8677_s4] ss:$0 sm:$0xff] }
 0x2ff   :  { %6121 = vmatprep.subr.bf16.mxu1 %v7750_v46 }
 0x301   :  { %5592 = vmatmul.mubr.f32.gmra.mrb[18].mxu1 %v8173_v47 }
 0x302   :  { %5594 = vmatprep.mubr.f32.mxu1 %v8185_v39  ;;  %6123 = vmatpush3.bf16.msra.mxu1 %v7750_v46 }
 0x303   :  { %6125 = vmatprep.subr.bf16.mxu1 %v7811_v60 }
 0x305   :  { %5595 = vmatmul.mubr.f32.gmra.mrb[20].mxu1 %v8196_v48 }
 0x306   :  { %5597 = vmatprep.mubr.f32.mxu1 %v8209_v9  ;;  %6127 = vmatpush3.bf16.msra.mxu1 %v7811_v60 }
 0x307   :  { %6129 = vmatprep.subr.bf16.mxu1 %v7835_v20 }
 0x309   :  { %5598 = vmatmul.mubr.f32.gmra.mrb[22].mxu1 %v8222_v6 }
 0x30a   :  { %5600 = vmatprep.mubr.f32.mxu1 %v8235_v19  ;;  %6131 = vmatpush3.bf16.msra.mxu1 %v7835_v20 }
 0x30b   :  { %6133 = vmatprep.subr.bf16.mxu1 %v7859_v56 }
 0x30d   :  { %5601 = vmatmul.mubr.f32.gmra.mrb[24].mxu1 %v8248_v38 }
 0x30e   :  { %5603 = vmatprep.mubr.f32.mxu1 %v8261_v17  ;;  %6135 = vmatpush3.bf16.msra.mxu1 %v7859_v56 }
 0x30f   :  { %6137 = vmatprep.subr.bf16.mxu1 %v7883_v3 }
 0x311   :  { %5604 = vmatmul.mubr.f32.gmra.mrb[26].mxu1 %v8274_v10 }
 0x312   :  { %5606 = vmatprep.mubr.f32.mxu1 %v8286_v15  ;;  %6139 = vmatpush3.bf16.msra.mxu1 %v7883_v3 }
 0x313   :  { %6141 = vmatprep.subr.bf16.mxu1 %v7907_v24 }
 0x315   :  { %5607 = vmatmul.mubr.f32.gmra.mrb[28].mxu1 %v8297_v30 }
 0x316   :  { %5609 = vmatprep.mubr.f32.mxu1 %v8308_v18  ;;  %6143 = vmatpush3.bf16.msra.mxu1 %v7907_v24 }
 0x317   :  { %6145 = vmatprep.subr.bf16.mxu1 %v7931_v28 }
 0x319   :  { %5610 = vmatmul.mubr.f32.gmra.mrb[30].mxu1 %v8318_v59 }
 0x31a   :  { %6147 = vmatpush3.bf16.msra.mxu1 %v7931_v28  ;;  %5644 = vmatprep.mubr.f32.mxu1 %v8138_v8 }
 0x31d   :  { %5645 = vmatmul.mubr.f32.vlgmr.msra.gmra.mrb[16].mxu1 %v8151_v45 }
 0x31e   :  { %5647 = vmatprep.mubr.f32.mxu1 %v8163_v27 }
 0x321   :  { %5648 = vmatmul.mubr.f32.gmra.mrb[18].mxu1 %v8173_v47 }
 0x322   :  { %5650 = vmatprep.mubr.f32.mxu1 %v8185_v39 }
 0x325   :  { %5651 = vmatmul.mubr.f32.gmra.mrb[20].mxu1 %v8196_v48 }
 0x326   :  { %5653 = vmatprep.mubr.f32.mxu1 %v8209_v9 }
 0x329   :  { %5654 = vmatmul.mubr.f32.gmra.mrb[22].mxu1 %v8222_v6 }
 0x32a   :  { %5656 = vmatprep.mubr.f32.mxu1 %v8235_v19 }
 0x32d   :  { %5657 = vmatmul.mubr.f32.gmra.mrb[24].mxu1 %v8248_v38 }
 0x32e   :  { %5659 = vmatprep.mubr.f32.mxu1 %v8261_v17 }
 0x331   :  { %5660 = vmatmul.mubr.f32.gmra.mrb[26].mxu1 %v8274_v10 }
 0x332   :  { %5662 = vmatprep.mubr.f32.mxu1 %v8286_v15 }
 0x335   :  { %5663 = vmatmul.mubr.f32.gmra.mrb[28].mxu1 %v8297_v30 }
 0x336   :  { %5665 = vmatprep.mubr.f32.mxu1 %v8308_v18 }
 0x339   :  { %5666 = vmatmul.mubr.f32.gmra.mrb[30].mxu1 %v8318_v59  ;;  %v6585_v59 = vmov 0  }
 0x33a   :  { %6490 = vset.pattern.permute.xlu1 %v6585_v59  ;;  %6491 = vset.pattern.permute.xlu0 %v6585_v59 }
 0x3f0   :  { %v5646_v46 = vpop.f32.mrb[16].mxu1 }
 0x3f1   :  { %v8509_v60 = vadd.f32 %v5646_v46, %v4665_v51  ;;  %v4193_v20 = vpop.f32.mrb[17].mxu1 }
 0x3f2   :  { %v8513_v3 = vadd.f32 %v4665_v51, %v4193_v20 }
 0x3f3   :  { %4305 = vrot.lane.b32.xlu0 %v8509_v60, %s6584_s18 }
 0x3f4   :  { %v5649_v56 = vpop.f32.mrb[18].mxu1 }
 0x3f5   :  { %v8515_v24 = vadd.f32 %v5649_v56, %v4665_v51  ;;  %v4205_v28 = vpop.f32.mrb[19].mxu1 }
 0x3f6   :  { %v8521_v8 = vadd.f32 %v4665_v51, %v4205_v28 }
 0x3f7   :  { %4309 = vrot.lane.b32.xlu1 %v8515_v24, %s6584_s18  ;;  %4303 = vrot.lane.b32.xlu0 %v8513_v3, %s6584_s18 }
 0x3f8   :  { %v5652_v47 = vpop.f32.mrb[20].mxu1 }
 0x3f9   :  { %v4217_v45 = vpop.f32.mrb[21].mxu1  ;;  %v8529_v30 = vadd.f32 %v5652_v47, %v4665_v51 }
 0x3fa   :  { %v8523_v27 = vadd.f32 %v4665_v51, %v4217_v45 }
 0x3fb   :  { %4307 = vrot.lane.b32.xlu1 %v8521_v8, %s6584_s18 }
 0x3fc   :  { %v5655_v39 = vpop.f32.mrb[22].mxu1  ;;  %4311 = vrot.lane.b32.xlu0 %v8523_v27, %s6584_s18 }
 0x3fd   :  { %v4229_v48 = vpop.f32.mrb[23].mxu1  ;;  %v8537_v19 = vadd.f32 %v5655_v39, %v4665_v51 }
 0x3fe   :  { %v8531_v9 = vadd.f32 %v4665_v51, %v4229_v48 }
 0x3ff   :  { %4313 = vrot.lane.b32.xlu1 %v8529_v30, %s6584_s18 }
 0x400   :  { %v5658_v6 = vpop.f32.mrb[24].mxu1  ;;  %4315 = vrot.lane.b32.xlu0 %v8531_v9, %s6584_s18 }
 0x401   :  { %v4241_v38 = vpop.f32.mrb[25].mxu1  ;;  %v8545_v40 = vadd.f32 %v5658_v6, %v4665_v51 }
 0x402   :  { %v8539_v17 = vadd.f32 %v4665_v51, %v4241_v38 }
 0x403   :  { %4317 = vrot.lane.b32.xlu1 %v8537_v19, %s6584_s18 }
 0x404   :  { %v5661_v10 = vpop.f32.mrb[26].mxu1  ;;  %4319 = vrot.lane.b32.xlu0 %v8539_v17, %s6584_s18 }
 0x405   :  { %v4253_v15 = vpop.f32.mrb[27].mxu1  ;;  %v8553_v5 = vadd.f32 %v5661_v10, %v4665_v51 }
 0x406   :  { %v8547_v54 = vadd.f32 %v4665_v51, %v4253_v15 }
 0x407   :  { %4321 = vrot.lane.b32.xlu1 %v8545_v40, %s6584_s18 }
 0x408   :  { %v5664_v44 = vpop.f32.mrb[28].mxu1  ;;  %4323 = vrot.lane.b32.xlu0 %v8547_v54, %s6584_s18 }
 0x409   :  { %v4265_v18 = vpop.f32.mrb[29].mxu1  ;;  %v8561_v53 = vadd.f32 %v5664_v44, %v4665_v51 }
 0x40a   :  { %v8555_v37 = vadd.f32 %v4665_v51, %v4265_v18 }
 0x40b   :  { %4325 = vrot.lane.b32.xlu1 %v8553_v5, %s6584_s18 }
 0x40c   :  { %v5667_v58 = vpop.f32.mrb[30].mxu1  ;;  %4327 = vrot.lane.b32.xlu0 %v8555_v37, %s6584_s18 }
 0x40d   :  { %v4277_v31 = vpop.f32.mrb[31].mxu1  ;;  %v8569_v32 = vadd.f32 %v5667_v58, %v4665_v51 }
 0x40e   :  { %v8563_v61 = vadd.f32 %v4665_v51, %v4277_v31 }
 0x40f   :  { %4329 = vrot.lane.b32.xlu1 %v8561_v53, %s6584_s18 }
 0x410   :  { %4331 = vrot.lane.b32.xlu0 %v8563_v61, %s6584_s18 }
 0x413   :  { %4333 = vrot.lane.b32.xlu1 %v8569_v32, %s6584_s18 }
 0x465   :  { %v8573_v1 = vpop.permute.xlu0 %4305 }
 0x466   :  { %v4368_v34 = vsub.f32 %v8509_v60, %v8573_v1 }
 0x468   :  { %v4384_v14 = vand.u32 2147483647, %v4368_v34 }
 0x469   :  { %v8577_v41 = vpop.permute.xlu1 %4309  ;;  %v8579_v21 = vpop.permute.xlu0 %4303 }
 0x46a   :  { %v4400_v42 = vsub.f32 0.0, %v4384_v14  ;;  %v4370_v33 = vsub.f32 %v8515_v24, %v8577_v41  ;;  %v4367_v7 = vsub.f32 %v8513_v3, %v8579_v21 }
 0x46c   :  { %v4417_v2 = vmul.f32 1.442695, %v4400_v42  ;;  %v4386_v12 = vand.u32 2147483647, %v4370_v33  ;;  %v4383_v26 = vand.u32 2147483647, %v4367_v7 }
 0x46d   :  { %v8585_v62 = vpop.permute.xlu1 %4307 }
 0x46e   :  { %6492 = vpow2.f32 %v4417_v2  ;;  %v4402_v16 = vsub.f32 0.0, %v4386_v12  ;;  %v4369_v35 = vsub.f32 %v8521_v8, %v8585_v62  ;;  %v8589_v55 = vpop.permute.xlu0 %4311  ;;  %v4399_v50 = vsub.f32 0.0, %v4383_v26 }
 0x46f   :  { %v4371_v0 = vsub.f32 %v8523_v27, %v8589_v55 }
 0x470   :  { %v4421_v29 = vmul.f32 1.442695, %v4402_v16  ;;  %v4385_v52 = vand.u32 2147483647, %v4369_v35  ;;  %v4415_v63 = vmul.f32 1.442695, %v4399_v50 }
 0x471   :  { %v4387_v49 = vand.u32 2147483647, %v4371_v0  ;;  %v8593_v43 = vpop.permute.xlu1 %4313 }
 0x472   :  { %6494 = vpow2.f32 %v4421_v29  ;;  %v4401_v22 = vsub.f32 0.0, %v4385_v52  ;;  %v4372_v23 = vsub.f32 %v8529_v30, %v8593_v43  ;;  %v8597_v4 = vpop.permute.xlu0 %4315 }
 0x473   :  { %6496 = vpow2.f32 %v4415_v63  ;;  %v4403_v13 = vsub.f32 0.0, %v4387_v49  ;;  %v4373_v25 = vsub.f32 %v8531_v9, %v8597_v4 }
 0x474   :  { %v4419_v36 = vmul.f32 1.442695, %v4401_v22  ;;  %v4388_v11 = vand.u32 2147483647, %v4372_v23 }
 0x475   :  { %v4423_v57 = vmul.f32 1.442695, %v4403_v13  ;;  %v4389_v51 = vand.u32 2147483647, %v4373_v25  ;;  %v8601_v46 = vpop.permute.xlu1 %4317 }
 0x476   :  { %6498 = vpow2.f32 %v4419_v36  ;;  %v4404_v20 = vsub.f32 0.0, %v4388_v11  ;;  %v4374_v56 = vsub.f32 %v8537_v19, %v8601_v46  ;;  %v8605_v28 = vpop.permute.xlu0 %4319 }
 0x477   :  { %6500 = vpow2.f32 %v4423_v57  ;;  %v4405_v47 = vsub.f32 0.0, %v4389_v51  ;;  %v4375_v45 = vsub.f32 %v8539_v17, %v8605_v28 }
 0x478   :  { %v6493_v39 = vpop.eup %6492  ;;  %v4425_v48 = vmul.f32 1.442695, %v4404_v20  ;;  %v4390_v6 = vand.u32 2147483647, %v4374_v56 }
 0x479   :  { %v4448_v38 = vadd.f32 1.0, %v6493_v39  ;;  %v4427_v10 = vmul.f32 1.442695, %v4405_v47  ;;  %v4391_v15 = vand.u32 2147483647, %v4375_v45  ;;  %v8609_v44 = vpop.permute.xlu1 %4321 }
 0x47a   :  { %6502 = vpow2.f32 %v4425_v48  ;;  %v4406_v18 = vsub.f32 0.0, %v4390_v6  ;;  %v4376_v58 = vsub.f32 %v8545_v40, %v8609_v44  ;;  %v8613_v59 = vpop.permute.xlu0 %4323 }
 0x47b   :  { %6504 = vlog2.f32 %v4448_v38  ;;  %v4407_v31 = vsub.f32 0.0, %v4391_v15  ;;  %v4377_v34 = vsub.f32 %v8547_v54, %v8613_v59 }
 0x47c   :  { %v6495_v14 = vpop.eup %6494  ;;  %6506 = vpow2.f32 %v4427_v10  ;;  %v4429_v42 = vmul.f32 1.442695, %v4406_v18  ;;  %v4392_v33 = vand.u32 2147483647, %v4376_v58 }
 0x47d   :  { %v6497_v7 = vpop.eup %6496  ;;  %v4450_v2 = vadd.f32 1.0, %v6495_v14  ;;  %v4431_v12 = vmul.f32 1.442695, %v4407_v31  ;;  %v4393_v26 = vand.u32 2147483647, %v4377_v34  ;;  %v8617_v16 = vpop.permute.xlu1 %4325  ;;  %v4352_v31 = vmax.f32 %v8509_v60, %v8573_v1 }
 0x47e   :  { %v4447_v35 = vadd.f32 1.0, %v6497_v7  ;;  %6508 = vpow2.f32 %v4429_v42  ;;  %v4408_v50 = vsub.f32 0.0, %v4392_v33  ;;  %v8619_v0 = vpop.permute.xlu0 %4327  ;;  %v4378_v52 = vsub.f32 %v8553_v5, %v8617_v16 }
 0x47f   :  { %6510 = vlog2.f32 %v4450_v2  ;;  %v4409_v29 = vsub.f32 0.0, %v4393_v26  ;;  %v4379_v22 = vsub.f32 %v8555_v37, %v8619_v0 }
 0x480   :  { %v6499_v63 = vpop.eup %6498  ;;  %6512 = vlog2.f32 %v4447_v35  ;;  %v4433_v49 = vmul.f32 1.442695, %v4408_v50  ;;  %v4394_v36 = vand.u32 2147483647, %v4378_v52 }
 0x481   :  { %v6501_v23 = vpop.eup %6500  ;;  %v4449_v13 = vadd.f32 1.0, %v6499_v63  ;;  %6514 = vpow2.f32 %v4431_v12  ;;  %v4435_v25 = vmul.f32 1.442695, %v4409_v29  ;;  %v8625_v11 = vpop.permute.xlu1 %4329  ;;  %v4395_v51 = vand.u32 2147483647, %v4379_v22 }
 0x482   :  { %v4451_v57 = vadd.f32 1.0, %v6501_v23  ;;  %6516 = vpow2.f32 %v4433_v49  ;;  %v8627_v20 = vpop.permute.xlu0 %4331  ;;  %v4410_v56 = vsub.f32 0.0, %v4394_v36  ;;  %v4380_v47 = vsub.f32 %v8561_v53, %v8625_v11 }
 0x483   :  { %6518 = vlog2.f32 %v4449_v13  ;;  %v4411_v39 = vsub.f32 0.0, %v4395_v51  ;;  %v4381_v48 = vsub.f32 %v8563_v61, %v8627_v20  ;;  %v4351_v22 = vmax.f32 %v8513_v3, %v8579_v21 }
 0x484   :  { %v6503_v45 = vpop.eup %6502  ;;  %6520 = vlog2.f32 %v4451_v57  ;;  %v4437_v10 = vmul.f32 1.442695, %v4410_v56  ;;  %v4396_v15 = vand.u32 2147483647, %v4380_v47  ;;  %v4354_v21 = vmax.f32 %v8515_v24, %v8577_v41 }
 0x485   :  { %v6505_v6 = vpop.eup %6504  ;;  %v4452_v38 = vadd.f32 1.0, %v6503_v45  ;;  %6522 = vpow2.f32 %v4435_v25  ;;  %v8633_v18 = vpop.permute.xlu1 %4333  ;;  %v4439_v14 = vmul.f32 1.442695, %v4411_v39  ;;  %v4397_v42 = vand.u32 2147483647, %v4381_v48 }
 0x486   :  { %v6507_v58 = vpop.eup %6506  ;;  %v4466_v34 = vmul.f32 0.6931472, %v6505_v6  ;;  %v4412_v7 = vsub.f32 0.0, %v4396_v15  ;;  %v4382_v2 = vsub.f32 %v8569_v32, %v8633_v18  ;;  %v4353_v48 = vmax.f32 %v8521_v8, %v8585_v62 }
 0x487   :  { %6524 = vlog2.f32 %v4452_v38  ;;  %v4453_v33 = vadd.f32 1.0, %v6507_v58  ;;  %v4413_v35 = vsub.f32 0.0, %v4397_v42  ;;  %v4355_v42 = vmax.f32 %v8523_v27, %v8589_v55 }
 0x488   :  { %v6509_v12 = vpop.eup %6508  ;;  %v4496_v26 = vadd.f32 %v4466_v34, %v4352_v31  ;;  %6526 = vpow2.f32 %v4437_v10  ;;  %v4441_v52 = vmul.f32 1.442695, %v4412_v7  ;;  %v4398_v63 = vand.u32 2147483647, %v4382_v2 }
 0x489   :  { %v6511_v50 = vpop.eup %6510  ;;  %6528 = vlog2.f32 %v4453_v33  ;;  %v4454_v29 = vadd.f32 1.0, %v6509_v12  ;;  %v4443_v60 = vmul.f32 1.442695, %v4413_v35  ;;  %v4356_v8 = vmax.f32 %v8529_v30, %v8593_v43 }
 0x48a   :  { %v6513_v49 = vpop.eup %6512  ;;  %6530 = vpow2.f32 %v4439_v14  ;;  %4518 = vperm.xlu1 %6490, %v4496_v26   ;;  %v4414_v13 = vsub.f32 0.0, %v4398_v63  ;;  %v4470_v36 = vmul.f32 0.6931472, %v6511_v50  ;;  %v4357_v27 = vmax.f32 %v8531_v9, %v8597_v4 }
 0x48b   :  { %v6515_v1 = vpop.eup %6514  ;;  %v4464_v23 = vmul.f32 0.6931472, %v6513_v49  ;;  %6532 = vlog2.f32 %v4454_v29  ;;  %v4358_v30 = vmax.f32 %v8537_v19, %v8601_v46  ;;  %v4359_v9 = vmax.f32 %v8539_v17, %v8605_v28 }
 0x48c   :  { %v6517_v25 = vpop.eup %6516  ;;  %v4455_v57 = vadd.f32 1.0, %v6515_v1  ;;  %6534 = vpow2.f32 %v4441_v52  ;;  %v4445_v45 = vmul.f32 1.442695, %v4414_v13  ;;  %v4498_v34 = vadd.f32 %v4470_v36, %v4354_v21 }
 0x48d   :  { %v6519_v51 = vpop.eup %6518  ;;  %v4495_v56 = vadd.f32 %v4464_v23, %v4351_v22  ;;  %v4456_v47 = vadd.f32 1.0, %v6517_v25  ;;  %6536 = vpow2.f32 %v4443_v60  ;;  %v4360_v19 = vmax.f32 %v8545_v40, %v8609_v44 }
 0x48e   :  { %v6521_v39 = vpop.eup %6520  ;;  %v4468_v6 = vmul.f32 0.6931472, %v6519_v51  ;;  %6538 = vlog2.f32 %v4455_v57  ;;  %v4361_v51 = vmax.f32 %v8547_v54, %v8613_v59  ;;  %v4362_v40 = vmax.f32 %v8553_v5, %v8617_v16 }
 0x48f   :  { %v6523_v38 = vpop.eup %6522  ;;  %6540 = vlog2.f32 %v4456_v47  ;;  %4513 = vperm.xlu0 %6491, %v4495_v56   ;;  %v4472_v15 = vmul.f32 0.6931472, %v6521_v39  ;;  %v4364_v54 = vmax.f32 %v8561_v53, %v8625_v11  ;;  %v4365_v5 = vmax.f32 %v8563_v61, %v8627_v20 }
 0x490   :  { %v4497_v10 = vadd.f32 %v4468_v6, %v4353_v48  ;;  %v4457_v58 = vadd.f32 1.0, %v6523_v38  ;;  %6542 = vpow2.f32 %v4445_v45  ;;  %v4363_v45 = vmax.f32 %v8555_v37, %v8619_v0 }
 0x491   :  { %v6525_v31 = vpop.eup %6524  ;;  %v4499_v7 = vadd.f32 %v4472_v15, %v4355_v42  ;;  %v4366_v37 = vmax.f32 %v8569_v32, %v8633_v18 }
 0x492   :  { %v6527_v14 = vpop.eup %6526  ;;  %v4474_v62 = vmul.f32 0.6931472, %v6525_v31  ;;  %6544 = vlog2.f32 %v4457_v58  ;;  %4523 = vperm.xlu1 %6490, %v4497_v10  }
 0x493   :  { %v6529_v33 = vpop.eup %6528  ;;  %v4458_v24 = vadd.f32 1.0, %v6527_v14  ;;  %4528 = vperm.xlu0 %6491, %v4498_v34  }
 0x494   :  { %v6531_v41 = vpop.eup %6530  ;;  %v4500_v2 = vadd.f32 %v4474_v62, %v4356_v8  ;;  %v4476_v12 = vmul.f32 0.6931472, %v6529_v33 }
 0x495   :  { %v6533_v26 = vpop.eup %6532  ;;  %6546 = vlog2.f32 %v4458_v24  ;;  %v4459_v35 = vadd.f32 1.0, %v6531_v41 }
 0x496   :  { %v6535_v50 = vpop.eup %6534  ;;  %v4478_v55 = vmul.f32 0.6931472, %v6533_v26  ;;  %4533 = vperm.xlu1 %6490, %v4499_v7   ;;  %v4501_v63 = vadd.f32 %v4476_v12, %v4357_v27 }
 0x497   :  { %v6537_v43 = vpop.eup %6536  ;;  %6548 = vlog2.f32 %v4459_v35  ;;  %v4460_v29 = vadd.f32 1.0, %v6535_v50  ;;  %4538 = vperm.xlu0 %6491, %v4500_v2  }
 0x498   :  { %v6539_v52 = vpop.eup %6538  ;;  %v4502_v49 = vadd.f32 %v4478_v55, %v4358_v30  ;;  %v4461_v60 = vadd.f32 1.0, %v6537_v43 }
 0x499   :  { %v6541_v1 = vpop.eup %6540  ;;  %v4480_v22 = vmul.f32 0.6931472, %v6539_v52  ;;  %6550 = vlog2.f32 %v4460_v29 }
 0x49a   :  { %v6543_v23 = vpop.eup %6542  ;;  %v4482_v4 = vmul.f32 0.6931472, %v6541_v1  ;;  %6552 = vlog2.f32 %v4461_v60  ;;  %4543 = vperm.xlu1 %6490, %v4501_v63  }
 0x49b   :  { %v4462_v46 = vadd.f32 1.0, %v6543_v23  ;;  %4548 = vperm.xlu0 %6491, %v4502_v49   ;;  %v4503_v25 = vadd.f32 %v4480_v22, %v4359_v9 }
 0x49c   :  { %v6545_v13 = vpop.eup %6544  ;;  %v4504_v36 = vadd.f32 %v4482_v4, %v4360_v19 }
 0x49d   :  { %v4484_v57 = vmul.f32 0.6931472, %v6545_v13  ;;  %6554 = vlog2.f32 %v4462_v46 }
 0x49e   :  { %4553 = vperm.xlu1 %6490, %v4503_v25  }
 0x49f   :  { %v6547_v56 = vpop.eup %6546  ;;  %4558 = vperm.xlu0 %6491, %v4504_v36   ;;  %v4505_v17 = vadd.f32 %v4484_v57, %v4361_v51 }
 0x4a0   :  { %v4486_v28 = vmul.f32 0.6931472, %v6547_v56 }
 0x4a1   :  { %v6549_v44 = vpop.eup %6548 }
 0x4a2   :  { %v4506_v47 = vadd.f32 %v4486_v28, %v4362_v40  ;;  %v4488_v39 = vmul.f32 0.6931472, %v6549_v44  ;;  %4563 = vperm.xlu1 %6490, %v4505_v17  }
 0x4a3   :  { %v6551_v48 = vpop.eup %6550 }
 0x4a4   :  { %v6553_v6 = vpop.eup %6552  ;;  %v4507_v38 = vadd.f32 %v4488_v39, %v4363_v45  ;;  %v4490_v59 = vmul.f32 0.6931472, %v6551_v48  ;;  %4568 = vperm.xlu0 %6491, %v4506_v47  }
 0x4a5   :  { %v4492_v21 = vmul.f32 0.6931472, %v6553_v6 }
 0x4a6   :  { %v4508_v10 = vadd.f32 %v4490_v59, %v4364_v54  ;;  %4573 = vperm.xlu1 %6490, %v4507_v38  }
 0x4a7   :  { %v6555_v16 = vpop.eup %6554  ;;  %v4509_v15 = vadd.f32 %v4492_v21, %v4365_v5 }
 0x4a8   :  { %v4494_v0 = vmul.f32 0.6931472, %v6555_v16  ;;  %4578 = vperm.xlu0 %6491, %v4508_v10  }
 0x4aa   :  { %v4510_v58 = vadd.f32 %v4494_v0, %v4366_v37  ;;  %4583 = vperm.xlu1 %6490, %v4509_v15  }
 0x4ac   :  { %4588 = vperm.xlu0 %6491, %v4510_v58  }
 0x509   :  { %v4519_v53 = vpop.permute.xlu1 %4518 }
 0x50e   :  { %v4514_v11 = vpop.permute.xlu0 %4513 }
 0x50f   :  { %v4591_v31 = vsub.f32 %v8513_v3, %v4514_v11 }
 0x511   :  { %4608 = vst.msk [vmem:[#allocation4] sm:$0xff] %vm4607_vm2, %v4591_v31  ;;  %v4524_v34 = vpop.permute.xlu1 %4523 }
 0x512   :  { %v4529_v14 = vpop.permute.xlu0 %4528 }
 0x515   :  { %v4534_v61 = vpop.permute.xlu1 %4533 }
 0x516   :  { %v4539_v20 = vpop.permute.xlu0 %4538 }
 0x518   :  { %v4641_v42 = vld [vmem:[#allocation4] sm:$0xf] }
 0x519   :  { %4642 = vst [vmem:[%s8678_s5] sm:$0xf] %v4641_v42  ;;  %v4544_v32 = vpop.permute.xlu1 %4543 }
 0x51a   :  { %v4549_v18 = vpop.permute.xlu0 %4548 }
 0x51d   :  { %v4554_v8 = vpop.permute.xlu1 %4553 }
 0x51e   :  { %v4559_v62 = vpop.permute.xlu0 %4558 }
 0x521   :  { %v4564_v33 = vpop.permute.xlu1 %4563 }
 0x523   :  { %v4569_v24 = vpop.permute.xlu0 %4568 }
 0x525   :  { %v4574_v41 = vpop.permute.xlu1 %4573 }
 0x527   :  { %v4579_v7 = vpop.permute.xlu0 %4578 }
 0x529   :  { %v4584_v2 = vpop.permute.xlu1 %4583 }
 0x52b   :  { %v4589_v3 = vpop.permute.xlu0 %4588 }
 0x52c   :  { %4659 = vsyncpa [#allocation3], 1 }

</bundles_post_ra>
